<compile_context>
chip_gen: v5e
topology: v5e:2x2
jax: 0.10.0
libtpu: 0.0.40
codegen_flags: <defaults>
</compile_context>

<pallas_src>
import jax
import jax.numpy as jnp
from jax import lax
from jax.experimental import pallas as pl
from jax.experimental.pallas import tpu as pltpu

BN_EPS = 1e-5
DIFFPOOL_EPS = 1e-15
# Build the (B*N, B*N) block-diagonal adjacency (single 2-D MXU matmul per aggregation)
# only while it comfortably fits VMEM; beyond that fall back to batched einsums.
_BLOCK_DIAG_MAX_BN = 512


def _round_up(v, m):
    return ((v + m - 1) // m) * m


# --------------------------------------------------------------------------- kernel math
def _diffpool_compute(x_flat, adj, mask_flat, w1, w2, w3p, w3e, w_lin, vh, vk, ve,
                      *, approx_recip):
    """DiffPoolLayer forward math (shared by the Pallas kernel and the XLA reference).

    x_flat    : (B*N, Cin)     node features, batch-flattened
    adj       : (B, N, N)      dense adjacency
    mask_flat : (B*N, 1)       {0,1} node mask
    w1        : (2*Cin, 2*H)   conv1, rows [rel; root], cols [pool | embed]
    w2        : (2, 2*H, H)    conv2, [rel; root] stacked rows, index 0=pool, 1=embed
    w3p/w3e   : (2*H, K/E)     conv3 [rel; root] for pool / embed
    w_lin     : (2*H + K, K)   pool lin on concat([p1, p2, p3])
    vh        : (6, 2*H)       [b1, g1, be1, b2, g2, be2], each pool|embed concatenated
    vk        : (2, K)         [pool conv3 bias, lin bias]
    ve        : (1, E)         [embed conv3 bias]
    """
    B, N, _ = adj.shape
    BN, _ = x_flat.shape
    H = w2.shape[-1]
    K = w3p.shape[-1]
    E = w3e.shape[-1]
    f32 = jnp.float32
    inv_cnt = 1.0 / float(BN)

    def recip(v):
        return pl.reciprocal(v, approx=True) if approx_recip else 1.0 / v

    def mm(a, w):
        return jnp.dot(a, w, preferred_element_type=f32)

    deg = jnp.maximum(jnp.sum(adj, axis=-1, keepdims=True), 1.0).reshape(BN, 1)
    inv_deg = recip(deg)

    if BN <= _BLOCK_DIAG_MAX_BN:
        # Block-diagonal adjacency: zero-padded lane/sublane concats only (no risky
        # reshape); every aggregate() below is a single 2-D MXU matmul.
        row_blocks = []
        for b in range(B):
            parts = []
            if b > 0:
                parts.append(jnp.zeros((N, b * N), f32))
            parts.append(adj[b])
            if b < B - 1:
                parts.append(jnp.zeros((N, (B - 1 - b) * N), f32))
            row_blocks.append(parts[0] if len(parts) == 1
                              else jnp.concatenate(parts, axis=-1))
        block_adj = row_blocks[0] if B == 1 else jnp.concatenate(row_blocks, axis=0)

        def aggregate(y_flat):                       # (BN, C) -> (BN, C)
            return mm(block_adj, y_flat) * inv_deg
    else:
        def aggregate(y_flat):
            y = y_flat.reshape(B, N, y_flat.shape[-1])
            out = jnp.einsum('bij,bjc->bic', adj, y, preferred_element_type=f32)
            return out.reshape(BN, y_flat.shape[-1]) * inv_deg

    def batch_norm(y, gamma, beta):
        # One-pass training-mode BN over all B*N rows (biased variance).
        s1 = jnp.sum(y, axis=0, keepdims=True)
        s2 = jnp.sum(y * y, axis=0, keepdims=True)
        mean = s1 * inv_cnt
        var = jnp.maximum(s2 * inv_cnt - mean * mean, 0.0)
        scale = lax.rsqrt(var + BN_EPS) * gamma[None, :]
        return (y - mean) * scale + beta[None, :]

    # ---- layer 1: pool+embed conv1 fused into ONE (BN, 2Cin) @ (2Cin, 2H) matmul --------
    agg_x = aggregate(x_flat)                                   # shared by both branches
    h1 = mm(jnp.concatenate([agg_x, x_flat], axis=-1), w1) + vh[0][None, :]
    h1 = h1 * mask_flat
    h1 = batch_norm(jnp.maximum(h1, 0.0), vh[1], vh[2])         # (BN, 2H) = [p1 | e1]

    # ---- layer 2: one shared aggregation; rel+root fused per branch ----------------------
    agg1 = aggregate(h1)                                        # (BN, 2H) = [agg p1|agg e1]
    h2 = jnp.concatenate(
        [mm(jnp.concatenate([agg1[:, :H], h1[:, :H]], axis=-1), w2[0]),
         mm(jnp.concatenate([agg1[:, H:], h1[:, H:]], axis=-1), w2[1])], axis=-1)
    h2 = (h2 + vh[3][None, :]) * mask_flat
    h2 = batch_norm(jnp.maximum(h2, 0.0), vh[4], vh[5])         # (BN, 2H) = [p2 | e2]

    # ---- layer 3: one shared aggregation; rel+root fused per branch ----------------------
    agg2 = aggregate(h2)
    p3 = (mm(jnp.concatenate([agg2[:, :H], h2[:, :H]], axis=-1), w3p)
          + vk[0][None, :]) * mask_flat                         # (BN, K)
    e3 = (mm(jnp.concatenate([agg2[:, H:], h2[:, H:]], axis=-1), w3e)
          + ve[0][None, :]) * mask_flat                         # (BN, E)

    # ---- pool assignment: lin(concat([p1, p2, p3])) as ONE (BN, 2H+K) @ (2H+K, K) matmul -
    s_logits = mm(jnp.concatenate([h1[:, :H], h2[:, :H], p3], axis=-1), w_lin) \
        + vk[1][None, :]                                        # (BN, K)

    # ---- dense_diff_pool (torch_geometric semantics) -------------------------------------
    s = jnp.exp(s_logits - jnp.max(s_logits, axis=-1, keepdims=True))
    s = s * recip(jnp.sum(s, axis=-1, keepdims=True))
    s = s * mask_flat                                           # mask BEFORE entropy (PyG)

    z = jnp.concatenate([h1[:, H:], h2[:, H:], e3], axis=-1) * mask_flat   # (BN, 2H+E)

    s_b = s.reshape(B, N, K)
    z_b = z.reshape(B, N, 2 * H + E)

    out_x = jnp.einsum('bnk,bnc->bkc', s_b, z_b, preferred_element_type=f32)   # (B,K,2H+E)

    sa = jnp.einsum('bnk,bnm->bkm', s_b, adj, preferred_element_type=f32)      # (B,K,N)
    out_adj = jnp.einsum('bkm,bmj->bkj', sa, s_b, preferred_element_type=f32)  # (B,K,K)

    # ||adj - s s^T||_F^2 = ||adj||^2 - 2 tr(s^T adj s) + ||s^T s||_F^2  (no (B,N,N) temp)
    adj_sq = jnp.sum(jnp.sum(adj * adj, axis=-1), axis=-1, keepdims=True)      # (B,1)
    eye_k = (lax.broadcasted_iota(jnp.int32, (K, K), 0) ==
             lax.broadcasted_iota(jnp.int32, (K, K), 1)).astype(f32)
    tr = jnp.sum(jnp.sum(out_adj * eye_k[None], axis=-1), axis=-1, keepdims=True)
    gram = jnp.einsum('bnk,bnj->bkj', s_b, s_b, preferred_element_type=f32)    # (B,K,K)
    gram_sq = jnp.sum(jnp.sum(gram * gram, axis=-1), axis=-1, keepdims=True)
    link_sq = jnp.maximum(adj_sq - 2.0 * tr + gram_sq, 0.0)                    # (B,1), >= 0

    ent = jnp.sum(-s_b * jnp.log(s_b + DIFFPOOL_EPS), axis=-1)                 # (B,N)
    ent_sum = jnp.sum(ent, axis=-1, keepdims=True)                             # (B,1)

    return out_x, out_adj, link_sq, ent_sum


def _diffpool_kernel(x_ref, adj_ref, mask_ref, w1_ref, w2_ref, w3p_ref, w3e_ref,
                     wlin_ref, vh_ref, vk_ref, ve_ref, outx_ref, slab_ref):
    out_x, out_adj, link_sq, ent_sum = _diffpool_compute(
        x_ref[...], adj_ref[...], mask_ref[...],
        w1_ref[...], w2_ref[...], w3p_ref[...], w3e_ref[...], wlin_ref[...],
        vh_ref[...], vk_ref[...], ve_ref[...], approx_recip=True)

    B, K, c_out = out_x.shape

    # Lane-dense store #1: out_x padded to a multiple-of-128 channel dim.
    cpad = outx_ref.shape[-1]
    if cpad > c_out:
        out_x = jnp.concatenate(
            [out_x, jnp.zeros((B, K, cpad - c_out), out_x.dtype)], axis=-1)
    outx_ref[...] = out_x

    # Lane-dense store #2: out_adj (row-wise flattened) + link_sq + ent_sum in one slab.
    parts = [out_adj[:, i, :] for i in range(K)] + [link_sq, ent_sum]
    used = K * K + 2
    spad = slab_ref.shape[-1]
    if spad > used:
        parts.append(jnp.zeros((B, spad - used), out_adj.dtype))
    slab_ref[...] = jnp.concatenate(parts, axis=-1)


# ------------------------------------------------------------------------ parameter packing
def _pack_params(pool_params, embed_params):
    (p_wr1, p_wo1, p_br1, p_g1, p_be1,
     p_wr2, p_wo2, p_br2, p_g2, p_be2,
     p_wr3, p_wo3, p_br3, p_wlin, p_blin) = pool_params
    (e_wr1, e_wo1, e_br1, e_g1, e_be1,
     e_wr2, e_wo2, e_br2, e_g2, e_be2,
     e_wr3, e_wo3, e_br3) = embed_params

    def flat(v):
        return v.reshape(-1)

    # conv1: rows [rel; root], cols [pool | embed]  ->  one (2*Cin, 2H) RHS.
    w1 = jnp.concatenate([jnp.concatenate([p_wr1, e_wr1], axis=1),
                          jnp.concatenate([p_wo1, e_wo1], axis=1)], axis=0)
    # conv2 per branch: rows [rel; root], stacked pool/embed.
    w2 = jnp.stack([jnp.concatenate([p_wr2, p_wo2], axis=0),
                    jnp.concatenate([e_wr2, e_wo2], axis=0)], axis=0)        # (2, 2H, H)
    w3p = jnp.concatenate([p_wr3, p_wo3], axis=0)                            # (2H, K)
    w3e = jnp.concatenate([e_wr3, e_wo3], axis=0)                            # (2H, E)
    vh = jnp.stack([jnp.concatenate([flat(p_br1), flat(e_br1)]),
                    jnp.concatenate([flat(p_g1), flat(e_g1)]),
                    jnp.concatenate([flat(p_be1), flat(e_be1)]),
                    jnp.concatenate([flat(p_br2), flat(e_br2)]),
                    jnp.concatenate([flat(p_g2), flat(e_g2)]),
                    jnp.concatenate([flat(p_be2), flat(e_be2)])], axis=0)    # (6, 2H)
    vk = jnp.stack([flat(p_br3), flat(p_blin)], axis=0)                      # (2, K)
    ve = flat(e_br3).reshape(1, -1)                                          # (1, E)
    return [w1, w2, w3p, w3e, p_wlin, vh, vk, ve]


# --------------------------------------------------------------------------------- wrapper
def diffpool_forward(x, adj, mask, pool_params, embed_params):
    B, N, Cin = x.shape
    H = pool_params[0].shape[-1]
    K = pool_params[10].shape[-1]          # no_new_clusters
    E = embed_params[10].shape[-1]
    BN = B * N
    c_out = 2 * H + E
    cpad = _round_up(c_out, 128)
    spad = _round_up(K * K + 2, 128)

    # Wrapper-side layout plumbing: flatten x and the mask so the kernel never relayouts.
    x_flat = x.reshape(BN, Cin).astype(jnp.float32)
    mask_flat = mask.reshape(BN, 1).astype(jnp.float32)

    inputs = [x_flat, adj.astype(jnp.float32), mask_flat] \
        + _pack_params(pool_params, embed_params)

    out_shapes = (
        jax.ShapeDtypeStruct((B, K, cpad), jnp.float32),   # padded pooled features
        jax.ShapeDtypeStruct((B, spad), jnp.float32),      # [adj flat | link_sq | ent_sum]
    )
    # Whole-array blocks (last two dims equal full dims -> tiling constraint satisfied).
    in_specs = [pl.BlockSpec(a.shape, lambda *_, nd=a.ndim: (0,) * nd) for a in inputs]
    out_specs = [pl.BlockSpec(s.shape, lambda *_, nd=len(s.shape): (0,) * nd)
                 for s in out_shapes]

    # TODO(synk): for large B/N, tile the grid over the batch axis ("parallel") with a
    # two-phase BatchNorm (per-channel sum/sumsq accumulators reduced across an "arbitrary"
    # axis / a second pallas_call), so v7x's two TensorCores are used and the full (B,N,N)
    # adjacency never has to be VMEM-resident at once (v7x has 64 MiB, not 128 MiB).
    out_x_pad, slab = pl.pallas_call(
        _diffpool_kernel,
        out_shape=out_shapes,
        grid=(1,),
        in_specs=in_specs,
        out_specs=out_specs,
        compiler_params=pltpu.CompilerParams(
            dimension_semantics=("arbitrary",),
            vmem_limit_bytes=32 * 1024 * 1024),
    )(*inputs)

    # Wrapper-side unpacking (free layout plumbing) + scalar finalization.
    out_x = out_x_pad[:, :, :c_out]
    out_adj = slab[:, :K * K].reshape(B, K, K)
    link_loss = jnp.sqrt(jnp.maximum(jnp.sum(slab[:, K * K]), 0.0)) / (B * N * N)
    ent_loss = jnp.sum(slab[:, K * K + 1]) / (B * N)
    return out_x, out_adj, link_loss, ent_loss


# ------------------------------------------------------------------------------ references
def optimized_reference(x, adj, mask, pool_params, embed_params):
    """Same (optimized) math as the kernel, run through plain XLA (exact division)."""
    B, N, Cin = x.shape
    packed = _pack_params(pool_params, embed_params)
    out_x, out_adj, link_sq, ent_sum = _diffpool_compute(
        x.reshape(B * N, Cin), adj, mask.reshape(B * N, 1).astype(jnp.float32),
        *packed, approx_recip=False)
    link_loss = jnp.sqrt(jnp.maximum(jnp.sum(link_sq), 0.0)) / (B * N * N)
    ent_loss = jnp.sum(ent_sum) / (B * N)
    return out_x, out_adj, link_loss, ent_loss


def naive_reference(x, adj, mask, pool_params, embed_params):
    """Direct, unoptimized transcription of the PyTorch DiffPoolLayer forward."""
    B, N, _ = x.shape
    mask3 = mask[:, :, None]
    deg = jnp.maximum(jnp.sum(adj, axis=-1, keepdims=True), 1.0)

    def sage_conv(xin, w_rel, w_root, b_rel):
        agg = jnp.einsum('bij,bjc->bic', adj, xin) / deg
        out = jnp.einsum('bnc,co->bno', agg, w_rel) + b_rel[None]
        out = out + jnp.einsum('bnc,co->bno', xin, w_root)
        return out * mask3

    def batch_norm(xin, gamma, beta):
        flat = xin.reshape(-1, xin.shape[-1])
        mean = jnp.mean(flat, axis=0)
        var = jnp.mean((flat - mean) ** 2, axis=0)
        out = (flat - mean) / jnp.sqrt(var + BN_EPS) * gamma.reshape(-1) + beta.reshape(-1)
        return out.reshape(xin.shape)

    def sage_stack(params, with_lin):
        (wr1, wo1, br1, g1, be1, wr2, wo2, br2, g2, be2, wr3, wo3, br3) = params[:13]
        x1 = batch_norm(jax.nn.relu(sage_conv(x, wr1, wo1, br1)), g1, be1)
        x2 = batch_norm(jax.nn.relu(sage_conv(x1, wr2, wo2, br2)), g2, be2)
        x3 = sage_conv(x2, wr3, wo3, br3)
        xc = jnp.concatenate([x1, x2, x3], axis=-1)
        if with_lin:
            xc = jnp.einsum('bnc,co->bno', xc, params[13]) + params[14][None]
        return xc

    s = jax.nn.softmax(sage_stack(list(pool_params), True), axis=-1)
    z = sage_stack(list(embed_params), False)
    z = z * mask3
    s = s * mask3
    out_x = jnp.einsum('bnk,bnc->bkc', s, z)
    out_adj = jnp.einsum('bnk,bnm,bmj->bkj', s, adj, s)
    diff = adj - jnp.einsum('bnk,bmk->bnm', s, s)
    link_loss = jnp.sqrt(jnp.sum(diff * diff)) / (B * N * N)
    ent_loss = jnp.mean(jnp.sum(-s * jnp.log(s + DIFFPOOL_EPS), axis=-1))
    return out_x, out_adj, link_loss, ent_loss


# ----------------------------------------------------------------------------------- setup
def init_sage_params(key, cin, hid, out, with_lin):
    """Deterministic parameter init.  Order matches the kernel's packing."""
    ks = list(jax.random.split(key, 16))

    def w(k, i, o):
        return jax.random.normal(k, (i, o), jnp.float32) * 0.1

    def b(k, o):
        return jax.random.normal(k, (1, o), jnp.float32) * 0.05

    params = []
    # conv1 + bn1
    params += [w(ks[0], cin, hid), w(ks[1], cin, hid), b(ks[2], hid)]
    params += [jnp.ones((1, hid), jnp.float32), jnp.zeros((1, hid), jnp.float32)]
    # conv2 + bn2
    params += [w(ks[3], hid, hid), w(ks[4], hid, hid), b(ks[5], hid)]
    params += [jnp.ones((1, hid), jnp.float32), jnp.zeros((1, hid), jnp.float32)]
    # conv3
    params += [w(ks[6], hid, out), w(ks[7], hid, out), b(ks[8], out)]
    if with_lin:
        params += [w(ks[9], 2 * hid + out, out), b(ks[10], out)]
    return params


if __name__ == "__main__":
    B, N = 2, 16
    dim_input, dim_hidden, dim_embedding = 32, 32, 32
    no_new_clusters = 8

    key = jax.random.PRNGKey(0)
    k_x, k_adj, k_pool, k_emb = jax.random.split(key, 4)

    x = jax.random.normal(k_x, (B, N, dim_input), jnp.float32)
    a = (jax.random.uniform(k_adj, (B, N, N)) > 0.7).astype(jnp.float32)
    adj = jnp.maximum(a, jnp.swapaxes(a, 1, 2))                    # symmetric 0/1 adjacency
    mask = jnp.stack([
        jnp.ones((N,), jnp.float32),
        jnp.concatenate([jnp.ones((12,), jnp.float32), jnp.zeros((4,), jnp.float32)]),
    ], axis=0)

    pool_params = init_sage_params(k_pool, dim_input, dim_hidden, no_new_clusters, True)
    embed_params = init_sage_params(k_emb, dim_input, dim_hidden, dim_embedding, False)

    out = diffpool_forward(x, adj, mask, pool_params, embed_params)
    out = jax.block_until_ready(out)

    # Kernel vs identical math through XLA (exact division vs in-kernel approx reciprocal,
    # hence the slightly loosened tolerance — sanctioned by the perf review).
    opt = optimized_reference(x, adj, mask, pool_params, embed_params)
    for o, r in zip(out, opt):
        assert jnp.allclose(o, r, atol=5e-3, rtol=5e-3)

    # Fidelity check: kernel vs a direct transcription of the PyTorch module (different but
    # mathematically equivalent association / trace-identity link loss / one-pass BN).
    ref = naive_reference(x, adj, mask, pool_params, embed_params)
    for o, r in zip(out, ref):
        assert jnp.allclose(o, r, atol=5e-3, rtol=5e-3)

    print("KERNEL_OK")
</pallas_src>

<mosaic_0001>
module attributes {stable_mosaic.version = 11 : i64} {
  func.func @_diffpool_kernel(%arg0: i32, %arg1: memref<32x32xf32, #tpu.memory_space<vmem>>, %arg2: memref<2x16x16xf32, #tpu.memory_space<vmem>>, %arg3: memref<32x1xf32, #tpu.memory_space<vmem>>, %arg4: memref<64x64xf32, #tpu.memory_space<vmem>>, %arg5: memref<2x64x32xf32, #tpu.memory_space<vmem>>, %arg6: memref<64x8xf32, #tpu.memory_space<vmem>>, %arg7: memref<64x32xf32, #tpu.memory_space<vmem>>, %arg8: memref<72x8xf32, #tpu.memory_space<vmem>>, %arg9: memref<6x64xf32, #tpu.memory_space<vmem>>, %arg10: memref<2x8xf32, #tpu.memory_space<vmem>>, %arg11: memref<1x32xf32, #tpu.memory_space<vmem>>, %arg12: memref<2x8x128xf32, #tpu.memory_space<vmem>>, %arg13: memref<2x128xf32, #tpu.memory_space<vmem>>) attributes {dimension_semantics = [#tpu.dimension_semantics<arbitrary>], iteration_bounds = array<i64: 1>, scalar_prefetch = 0 : i64, scratch_operands = 0 : i64, tpu.core_type = #tpu.core_type<tc>, window_params = [{pipeline_mode = #tpu.pipeline_mode<synchronous>, transform_indices = @transform_0, window_bounds = array<i64: 32, 32>}, {pipeline_mode = #tpu.pipeline_mode<synchronous>, transform_indices = @transform_1, window_bounds = array<i64: 2, 16, 16>}, {pipeline_mode = #tpu.pipeline_mode<synchronous>, transform_indices = @transform_2, window_bounds = array<i64: 32, 1>}, {pipeline_mode = #tpu.pipeline_mode<synchronous>, transform_indices = @transform_3, window_bounds = array<i64: 64, 64>}, {pipeline_mode = #tpu.pipeline_mode<synchronous>, transform_indices = @transform_4, window_bounds = array<i64: 2, 64, 32>}, {pipeline_mode = #tpu.pipeline_mode<synchronous>, transform_indices = @transform_5, window_bounds = array<i64: 64, 8>}, {pipeline_mode = #tpu.pipeline_mode<synchronous>, transform_indices = @transform_6, window_bounds = array<i64: 64, 32>}, {pipeline_mode = #tpu.pipeline_mode<synchronous>, transform_indices = @transform_7, window_bounds = array<i64: 72, 8>}, {pipeline_mode = #tpu.pipeline_mode<synchronous>, transform_indices = @transform_8, window_bounds = array<i64: 6, 64>}, {pipeline_mode = #tpu.pipeline_mode<synchronous>, transform_indices = @transform_9, window_bounds = array<i64: 2, 8>}, {pipeline_mode = #tpu.pipeline_mode<synchronous>, transform_indices = @transform_10, window_bounds = array<i64: 1, 32>}, {pipeline_mode = #tpu.pipeline_mode<synchronous>, transform_indices = @transform_11, window_bounds = array<i64: 2, 8, 128>}, {pipeline_mode = #tpu.pipeline_mode<synchronous>, transform_indices = @transform_12, window_bounds = array<i64: 2, 128>}]} {
    %c0 = arith.constant 0 : index
    %c0_0 = arith.constant 0 : index
    %0 = vector.load %arg1[%c0, %c0_0] : memref<32x32xf32, #tpu.memory_space<vmem>>, vector<32x32xf32>
    %c0_1 = arith.constant 0 : index
    %c0_2 = arith.constant 0 : index
    %c0_3 = arith.constant 0 : index
    %1 = vector.load %arg2[%c0_1, %c0_2, %c0_3] : memref<2x16x16xf32, #tpu.memory_space<vmem>>, vector<2x16x16xf32>
    %c0_4 = arith.constant 0 : index
    %c0_5 = arith.constant 0 : index
    %2 = vector.load %arg3[%c0_4, %c0_5] : memref<32x1xf32, #tpu.memory_space<vmem>>, vector<32x1xf32>
    %c0_6 = arith.constant 0 : index
    %c0_7 = arith.constant 0 : index
    %3 = vector.load %arg4[%c0_6, %c0_7] : memref<64x64xf32, #tpu.memory_space<vmem>>, vector<64x64xf32>
    %c0_8 = arith.constant 0 : index
    %c0_9 = arith.constant 0 : index
    %c0_10 = arith.constant 0 : index
    %4 = vector.load %arg5[%c0_8, %c0_9, %c0_10] : memref<2x64x32xf32, #tpu.memory_space<vmem>>, vector<2x64x32xf32>
    %c0_11 = arith.constant 0 : index
    %c0_12 = arith.constant 0 : index
    %5 = vector.load %arg6[%c0_11, %c0_12] : memref<64x8xf32, #tpu.memory_space<vmem>>, vector<64x8xf32>
    %c0_13 = arith.constant 0 : index
    %c0_14 = arith.constant 0 : index
    %6 = vector.load %arg7[%c0_13, %c0_14] : memref<64x32xf32, #tpu.memory_space<vmem>>, vector<64x32xf32>
    %c0_15 = arith.constant 0 : index
    %c0_16 = arith.constant 0 : index
    %7 = vector.load %arg8[%c0_15, %c0_16] : memref<72x8xf32, #tpu.memory_space<vmem>>, vector<72x8xf32>
    %c0_17 = arith.constant 0 : index
    %c0_18 = arith.constant 0 : index
    %8 = vector.load %arg9[%c0_17, %c0_18] : memref<6x64xf32, #tpu.memory_space<vmem>>, vector<6x64xf32>
    %c0_19 = arith.constant 0 : index
    %c0_20 = arith.constant 0 : index
    %9 = vector.load %arg10[%c0_19, %c0_20] : memref<2x8xf32, #tpu.memory_space<vmem>>, vector<2x8xf32>
    %c0_21 = arith.constant 0 : index
    %c0_22 = arith.constant 0 : index
    %10 = vector.load %arg11[%c0_21, %c0_22] : memref<1x32xf32, #tpu.memory_space<vmem>>, vector<1x32xf32>
    %cst = arith.constant dense<0.000000e+00> : vector<2x16xf32>
    %11 = vector.multi_reduction <add>, %1, %cst [2] : vector<2x16x16xf32> to vector<2x16xf32>
    %12 = vector.shape_cast %11 : vector<2x16xf32> to vector<2x16x1xf32>
    %cst_23 = arith.constant 1.000000e+00 : f32
    %13 = vector.broadcast %cst_23 : f32 to vector<2x16x1xf32>
    %14 = arith.maximumf %12, %13 : vector<2x16x1xf32>
    %15 = vector.shape_cast %14 : vector<2x16x1xf32> to vector<32x1xf32>
    %16 = tpu.reciprocal %15 {approx = true} : vector<32x1xf32> -> vector<32x1xf32>
    %17 = vector.extract_strided_slice %1 {offsets = [0, 0, 0], sizes = [1, 16, 16], strides = [1, 1, 1]} : vector<2x16x16xf32> to vector<1x16x16xf32>
    %18 = vector.shape_cast %17 : vector<1x16x16xf32> to vector<16x16xf32>
    %cst_24 = arith.constant 0.000000e+00 : f32
    %19 = vector.broadcast %cst_24 : f32 to vector<16x16xf32>
    %20 = tpu.concatenate %18, %19 in 1 : vector<16x16xf32>, vector<16x16xf32> -> vector<16x32xf32>
    %cst_25 = arith.constant 0.000000e+00 : f32
    %21 = vector.broadcast %cst_25 : f32 to vector<16x16xf32>
    %22 = vector.extract_strided_slice %1 {offsets = [1, 0, 0], sizes = [1, 16, 16], strides = [1, 1, 1]} : vector<2x16x16xf32> to vector<1x16x16xf32>
    %23 = vector.shape_cast %22 : vector<1x16x16xf32> to vector<16x16xf32>
    %24 = tpu.concatenate %21, %23 in 1 : vector<16x16xf32>, vector<16x16xf32> -> vector<16x32xf32>
    %25 = tpu.concatenate %20, %24 in 0 : vector<16x32xf32>, vector<16x32xf32> -> vector<32x32xf32>
    %cst_26 = arith.constant dense<0.000000e+00> : vector<32x32xf32>
    %26 = tpu.matmul %25, %0, %cst_26 {dimension_numbers = #tpu.dot_dimension_numbers<[1], [0], [0], [1], [0, 0, 1, 1], [], []>} : vector<32x32xf32>, vector<32x32xf32>, vector<32x32xf32> -> vector<32x32xf32>
    %27 = vector.broadcast %16 : vector<32x1xf32> to vector<32x32xf32>
    %28 = arith.mulf %26, %27 : vector<32x32xf32>
    %29 = tpu.concatenate %28, %0 in 1 : vector<32x32xf32>, vector<32x32xf32> -> vector<32x64xf32>
    %cst_27 = arith.constant dense<0.000000e+00> : vector<32x64xf32>
    %30 = tpu.matmul %29, %3, %cst_27 {dimension_numbers = #tpu.dot_dimension_numbers<[1], [0], [0], [1], [0, 0, 1, 1], [], []>} : vector<32x64xf32>, vector<64x64xf32>, vector<32x64xf32> -> vector<32x64xf32>
    %31 = vector.extract_strided_slice %8 {offsets = [0, 0], sizes = [1, 64], strides = [1, 1]} : vector<6x64xf32> to vector<1x64xf32>
    %32 = vector.shape_cast %31 : vector<1x64xf32> to vector<64xf32>
    %33 = vector.shape_cast %32 : vector<64xf32> to vector<1x64xf32>
    %34 = vector.broadcast %33 : vector<1x64xf32> to vector<32x64xf32>
    %35 = arith.addf %30, %34 : vector<32x64xf32>
    %36 = vector.broadcast %2 : vector<32x1xf32> to vector<32x64xf32>
    %37 = arith.mulf %35, %36 : vector<32x64xf32>
    %cst_28 = arith.constant 0.000000e+00 : f32
    %38 = vector.broadcast %cst_28 : f32 to vector<32x64xf32>
    %39 = arith.maximumf %37, %38 : vector<32x64xf32>
    %40 = vector.extract_strided_slice %8 {offsets = [1, 0], sizes = [1, 64], strides = [1, 1]} : vector<6x64xf32> to vector<1x64xf32>
    %41 = vector.shape_cast %40 : vector<1x64xf32> to vector<64xf32>
    %42 = vector.extract_strided_slice %8 {offsets = [2, 0], sizes = [1, 64], strides = [1, 1]} : vector<6x64xf32> to vector<1x64xf32>
    %43 = vector.shape_cast %42 : vector<1x64xf32> to vector<64xf32>
    %cst_29 = arith.constant dense<0.000000e+00> : vector<64xf32>
    %44 = vector.multi_reduction <add>, %39, %cst_29 [0] : vector<32x64xf32> to vector<64xf32>
    %45 = vector.shape_cast %44 : vector<64xf32> to vector<1x64xf32>
    %46 = arith.mulf %39, %39 : vector<32x64xf32>
    %cst_30 = arith.constant dense<0.000000e+00> : vector<64xf32>
    %47 = vector.multi_reduction <add>, %46, %cst_30 [0] : vector<32x64xf32> to vector<64xf32>
    %48 = vector.shape_cast %47 : vector<64xf32> to vector<1x64xf32>
    %cst_31 = arith.constant 3.125000e-02 : f32
    %49 = vector.broadcast %cst_31 : f32 to vector<1x64xf32>
    %50 = arith.mulf %45, %49 : vector<1x64xf32>
    %cst_32 = arith.constant 3.125000e-02 : f32
    %51 = vector.broadcast %cst_32 : f32 to vector<1x64xf32>
    %52 = arith.mulf %48, %51 : vector<1x64xf32>
    %53 = arith.mulf %50, %50 : vector<1x64xf32>
    %54 = arith.subf %52, %53 : vector<1x64xf32>
    %cst_33 = arith.constant 0.000000e+00 : f32
    %55 = vector.broadcast %cst_33 : f32 to vector<1x64xf32>
    %56 = arith.maximumf %54, %55 : vector<1x64xf32>
    %cst_34 = arith.constant 9.99999974E-6 : f32
    %57 = vector.broadcast %cst_34 : f32 to vector<1x64xf32>
    %58 = arith.addf %56, %57 : vector<1x64xf32>
    %59 = math.rsqrt %58 : vector<1x64xf32>
    %60 = vector.shape_cast %41 : vector<64xf32> to vector<1x64xf32>
    %61 = arith.mulf %59, %60 : vector<1x64xf32>
    %62 = vector.broadcast %50 : vector<1x64xf32> to vector<32x64xf32>
    %63 = arith.subf %39, %62 : vector<32x64xf32>
    %64 = vector.broadcast %61 : vector<1x64xf32> to vector<32x64xf32>
    %65 = arith.mulf %63, %64 : vector<32x64xf32>
    %66 = vector.shape_cast %43 : vector<64xf32> to vector<1x64xf32>
    %67 = vector.broadcast %66 : vector<1x64xf32> to vector<32x64xf32>
    %68 = arith.addf %65, %67 : vector<32x64xf32>
    %cst_35 = arith.constant dense<0.000000e+00> : vector<32x64xf32>
    %69 = tpu.matmul %25, %68, %cst_35 {dimension_numbers = #tpu.dot_dimension_numbers<[1], [0], [0], [1], [0, 0, 1, 1], [], []>} : vector<32x32xf32>, vector<32x64xf32>, vector<32x64xf32> -> vector<32x64xf32>
    %70 = vector.broadcast %16 : vector<32x1xf32> to vector<32x64xf32>
    %71 = arith.mulf %69, %70 : vector<32x64xf32>
    %72 = vector.extract_strided_slice %71 {offsets = [0, 0], sizes = [32, 32], strides = [1, 1]} : vector<32x64xf32> to vector<32x32xf32>
    %73 = vector.extract_strided_slice %68 {offsets = [0, 0], sizes = [32, 32], strides = [1, 1]} : vector<32x64xf32> to vector<32x32xf32>
    %74 = tpu.concatenate %72, %73 in 1 : vector<32x32xf32>, vector<32x32xf32> -> vector<32x64xf32>
    %75 = vector.extract_strided_slice %4 {offsets = [0, 0, 0], sizes = [1, 64, 32], strides = [1, 1, 1]} : vector<2x64x32xf32> to vector<1x64x32xf32>
    %76 = vector.shape_cast %75 : vector<1x64x32xf32> to vector<64x32xf32>
    %cst_36 = arith.constant dense<0.000000e+00> : vector<32x32xf32>
    %77 = tpu.matmul %74, %76, %cst_36 {dimension_numbers = #tpu.dot_dimension_numbers<[1], [0], [0], [1], [0, 0, 1, 1], [], []>} : vector<32x64xf32>, vector<64x32xf32>, vector<32x32xf32> -> vector<32x32xf32>
    %78 = vector.extract_strided_slice %71 {offsets = [0, 32], sizes = [32, 32], strides = [1, 1]} : vector<32x64xf32> to vector<32x32xf32>
    %79 = vector.extract_strided_slice %68 {offsets = [0, 32], sizes = [32, 32], strides = [1, 1]} : vector<32x64xf32> to vector<32x32xf32>
    %80 = tpu.concatenate %78, %79 in 1 : vector<32x32xf32>, vector<32x32xf32> -> vector<32x64xf32>
    %81 = vector.extract_strided_slice %4 {offsets = [1, 0, 0], sizes = [1, 64, 32], strides = [1, 1, 1]} : vector<2x64x32xf32> to vector<1x64x32xf32>
    %82 = vector.shape_cast %81 : vector<1x64x32xf32> to vector<64x32xf32>
    %cst_37 = arith.constant dense<0.000000e+00> : vector<32x32xf32>
    %83 = tpu.matmul %80, %82, %cst_37 {dimension_numbers = #tpu.dot_dimension_numbers<[1], [0], [0], [1], [0, 0, 1, 1], [], []>} : vector<32x64xf32>, vector<64x32xf32>, vector<32x32xf32> -> vector<32x32xf32>
    %84 = tpu.concatenate %77, %83 in 1 : vector<32x32xf32>, vector<32x32xf32> -> vector<32x64xf32>
    %85 = vector.extract_strided_slice %8 {offsets = [3, 0], sizes = [1, 64], strides = [1, 1]} : vector<6x64xf32> to vector<1x64xf32>
    %86 = vector.shape_cast %85 : vector<1x64xf32> to vector<64xf32>
    %87 = vector.shape_cast %86 : vector<64xf32> to vector<1x64xf32>
    %88 = vector.broadcast %87 : vector<1x64xf32> to vector<32x64xf32>
    %89 = arith.addf %84, %88 : vector<32x64xf32>
    %90 = vector.broadcast %2 : vector<32x1xf32> to vector<32x64xf32>
    %91 = arith.mulf %89, %90 : vector<32x64xf32>
    %cst_38 = arith.constant 0.000000e+00 : f32
    %92 = vector.broadcast %cst_38 : f32 to vector<32x64xf32>
    %93 = arith.maximumf %91, %92 : vector<32x64xf32>
    %94 = vector.extract_strided_slice %8 {offsets = [4, 0], sizes = [1, 64], strides = [1, 1]} : vector<6x64xf32> to vector<1x64xf32>
    %95 = vector.shape_cast %94 : vector<1x64xf32> to vector<64xf32>
    %96 = vector.extract_strided_slice %8 {offsets = [5, 0], sizes = [1, 64], strides = [1, 1]} : vector<6x64xf32> to vector<1x64xf32>
    %97 = vector.shape_cast %96 : vector<1x64xf32> to vector<64xf32>
    %cst_39 = arith.constant dense<0.000000e+00> : vector<64xf32>
    %98 = vector.multi_reduction <add>, %93, %cst_39 [0] : vector<32x64xf32> to vector<64xf32>
    %99 = vector.shape_cast %98 : vector<64xf32> to vector<1x64xf32>
    %100 = arith.mulf %93, %93 : vector<32x64xf32>
    %cst_40 = arith.constant dense<0.000000e+00> : vector<64xf32>
    %101 = vector.multi_reduction <add>, %100, %cst_40 [0] : vector<32x64xf32> to vector<64xf32>
    %102 = vector.shape_cast %101 : vector<64xf32> to vector<1x64xf32>
    %cst_41 = arith.constant 3.125000e-02 : f32
    %103 = vector.broadcast %cst_41 : f32 to vector<1x64xf32>
    %104 = arith.mulf %99, %103 : vector<1x64xf32>
    %cst_42 = arith.constant 3.125000e-02 : f32
    %105 = vector.broadcast %cst_42 : f32 to vector<1x64xf32>
    %106 = arith.mulf %102, %105 : vector<1x64xf32>
    %107 = arith.mulf %104, %104 : vector<1x64xf32>
    %108 = arith.subf %106, %107 : vector<1x64xf32>
    %cst_43 = arith.constant 0.000000e+00 : f32
    %109 = vector.broadcast %cst_43 : f32 to vector<1x64xf32>
    %110 = arith.maximumf %108, %109 : vector<1x64xf32>
    %cst_44 = arith.constant 9.99999974E-6 : f32
    %111 = vector.broadcast %cst_44 : f32 to vector<1x64xf32>
    %112 = arith.addf %110, %111 : vector<1x64xf32>
    %113 = math.rsqrt %112 : vector<1x64xf32>
    %114 = vector.shape_cast %95 : vector<64xf32> to vector<1x64xf32>
    %115 = arith.mulf %113, %114 : vector<1x64xf32>
    %116 = vector.broadcast %104 : vector<1x64xf32> to vector<32x64xf32>
    %117 = arith.subf %93, %116 : vector<32x64xf32>
    %118 = vector.broadcast %115 : vector<1x64xf32> to vector<32x64xf32>
    %119 = arith.mulf %117, %118 : vector<32x64xf32>
    %120 = vector.shape_cast %97 : vector<64xf32> to vector<1x64xf32>
    %121 = vector.broadcast %120 : vector<1x64xf32> to vector<32x64xf32>
    %122 = arith.addf %119, %121 : vector<32x64xf32>
    %cst_45 = arith.constant dense<0.000000e+00> : vector<32x64xf32>
    %123 = tpu.matmul %25, %122, %cst_45 {dimension_numbers = #tpu.dot_dimension_numbers<[1], [0], [0], [1], [0, 0, 1, 1], [], []>} : vector<32x32xf32>, vector<32x64xf32>, vector<32x64xf32> -> vector<32x64xf32>
    %124 = vector.broadcast %16 : vector<32x1xf32> to vector<32x64xf32>
    %125 = arith.mulf %123, %124 : vector<32x64xf32>
    %126 = vector.extract_strided_slice %125 {offsets = [0, 0], sizes = [32, 32], strides = [1, 1]} : vector<32x64xf32> to vector<32x32xf32>
    %127 = vector.extract_strided_slice %122 {offsets = [0, 0], sizes = [32, 32], strides = [1, 1]} : vector<32x64xf32> to vector<32x32xf32>
    %128 = tpu.concatenate %126, %127 in 1 : vector<32x32xf32>, vector<32x32xf32> -> vector<32x64xf32>
    %cst_46 = arith.constant dense<0.000000e+00> : vector<32x8xf32>
    %129 = tpu.matmul %128, %5, %cst_46 {dimension_numbers = #tpu.dot_dimension_numbers<[1], [0], [0], [1], [0, 0, 1, 1], [], []>} : vector<32x64xf32>, vector<64x8xf32>, vector<32x8xf32> -> vector<32x8xf32>
    %130 = vector.extract_strided_slice %9 {offsets = [0, 0], sizes = [1, 8], strides = [1, 1]} : vector<2x8xf32> to vector<1x8xf32>
    %131 = vector.shape_cast %130 : vector<1x8xf32> to vector<8xf32>
    %132 = vector.shape_cast %131 : vector<8xf32> to vector<1x8xf32>
    %133 = vector.broadcast %132 : vector<1x8xf32> to vector<32x8xf32>
    %134 = arith.addf %129, %133 : vector<32x8xf32>
    %135 = vector.broadcast %2 : vector<32x1xf32> to vector<32x8xf32>
    %136 = arith.mulf %134, %135 : vector<32x8xf32>
    %137 = vector.extract_strided_slice %125 {offsets = [0, 32], sizes = [32, 32], strides = [1, 1]} : vector<32x64xf32> to vector<32x32xf32>
    %138 = vector.extract_strided_slice %122 {offsets = [0, 32], sizes = [32, 32], strides = [1, 1]} : vector<32x64xf32> to vector<32x32xf32>
    %139 = tpu.concatenate %137, %138 in 1 : vector<32x32xf32>, vector<32x32xf32> -> vector<32x64xf32>
    %cst_47 = arith.constant dense<0.000000e+00> : vector<32x32xf32>
    %140 = tpu.matmul %139, %6, %cst_47 {dimension_numbers = #tpu.dot_dimension_numbers<[1], [0], [0], [1], [0, 0, 1, 1], [], []>} : vector<32x64xf32>, vector<64x32xf32>, vector<32x32xf32> -> vector<32x32xf32>
    %141 = vector.shape_cast %10 : vector<1x32xf32> to vector<32xf32>
    %142 = vector.shape_cast %141 : vector<32xf32> to vector<1x32xf32>
    %143 = vector.broadcast %142 : vector<1x32xf32> to vector<32x32xf32>
    %144 = arith.addf %140, %143 : vector<32x32xf32>
    %145 = vector.broadcast %2 : vector<32x1xf32> to vector<32x32xf32>
    %146 = arith.mulf %144, %145 : vector<32x32xf32>
    %147 = vector.extract_strided_slice %68 {offsets = [0, 0], sizes = [32, 32], strides = [1, 1]} : vector<32x64xf32> to vector<32x32xf32>
    %148 = vector.extract_strided_slice %122 {offsets = [0, 0], sizes = [32, 32], strides = [1, 1]} : vector<32x64xf32> to vector<32x32xf32>
    %149 = tpu.concatenate %147, %148, %136 in 1 : vector<32x32xf32>, vector<32x32xf32>, vector<32x8xf32> -> vector<32x72xf32>
    %cst_48 = arith.constant dense<0.000000e+00> : vector<32x8xf32>
    %150 = tpu.matmul %149, %7, %cst_48 {dimension_numbers = #tpu.dot_dimension_numbers<[1], [0], [0], [1], [0, 0, 1, 1], [], []>} : vector<32x72xf32>, vector<72x8xf32>, vector<32x8xf32> -> vector<32x8xf32>
    %151 = vector.extract_strided_slice %9 {offsets = [1, 0], sizes = [1, 8], strides = [1, 1]} : vector<2x8xf32> to vector<1x8xf32>
    %152 = vector.shape_cast %151 : vector<1x8xf32> to vector<8xf32>
    %153 = vector.shape_cast %152 : vector<8xf32> to vector<1x8xf32>
    %154 = vector.broadcast %153 : vector<1x8xf32> to vector<32x8xf32>
    %155 = arith.addf %150, %154 : vector<32x8xf32>
    %cst_49 = arith.constant dense<0xFF800000> : vector<32xf32>
    %156 = vector.multi_reduction <maximumf>, %155, %cst_49 [1] : vector<32x8xf32> to vector<32xf32>
    %157 = vector.shape_cast %156 : vector<32xf32> to vector<32x1xf32>
    %158 = vector.broadcast %157 : vector<32x1xf32> to vector<32x8xf32>
    %159 = arith.subf %155, %158 : vector<32x8xf32>
    %160 = math.exp %159 : vector<32x8xf32>
    %cst_50 = arith.constant dense<0.000000e+00> : vector<32xf32>
    %161 = vector.multi_reduction <add>, %160, %cst_50 [1] : vector<32x8xf32> to vector<32xf32>
    %162 = vector.shape_cast %161 : vector<32xf32> to vector<32x1xf32>
    %163 = tpu.reciprocal %162 {approx = true} : vector<32x1xf32> -> vector<32x1xf32>
    %164 = vector.broadcast %163 : vector<32x1xf32> to vector<32x8xf32>
    %165 = arith.mulf %160, %164 : vector<32x8xf32>
    %166 = vector.broadcast %2 : vector<32x1xf32> to vector<32x8xf32>
    %167 = arith.mulf %165, %166 : vector<32x8xf32>
    %168 = vector.extract_strided_slice %68 {offsets = [0, 32], sizes = [32, 32], strides = [1, 1]} : vector<32x64xf32> to vector<32x32xf32>
    %169 = vector.extract_strided_slice %122 {offsets = [0, 32], sizes = [32, 32], strides = [1, 1]} : vector<32x64xf32> to vector<32x32xf32>
    %170 = tpu.concatenate %168, %169, %146 in 1 : vector<32x32xf32>, vector<32x32xf32>, vector<32x32xf32> -> vector<32x96xf32>
    %171 = vector.broadcast %2 : vector<32x1xf32> to vector<32x96xf32>
    %172 = arith.mulf %170, %171 : vector<32x96xf32>
    %173 = vector.shape_cast %167 : vector<32x8xf32> to vector<2x16x8xf32>
    %174 = vector.shape_cast %172 : vector<32x96xf32> to vector<2x16x96xf32>
    "tpu.trace_start"() <{level = 10 : i32, message = "bnk,bnc->bkc"}> : () -> ()
    %cst_51 = arith.constant dense<0.000000e+00> : vector<2x8x96xf32>
    %175 = tpu.matmul %173, %174, %cst_51 {dimension_numbers = #tpu.dot_dimension_numbers<[1], [1], [2], [2], [0, 0, 0, 2, 1, 2], [0], [0]>} : vector<2x16x8xf32>, vector<2x16x96xf32>, vector<2x8x96xf32> -> vector<2x8x96xf32>
    "tpu.trace_stop"() : () -> ()
    "tpu.trace_start"() <{level = 10 : i32, message = "bnk,bnm->bkm"}> : () -> ()
    %cst_52 = arith.constant dense<0.000000e+00> : vector<2x8x16xf32>
    %176 = tpu.matmul %173, %1, %cst_52 {dimension_numbers = #tpu.dot_dimension_numbers<[1], [1], [2], [2], [0, 0, 0, 2, 1, 2], [0], [0]>} : vector<2x16x8xf32>, vector<2x16x16xf32>, vector<2x8x16xf32> -> vector<2x8x16xf32>
    "tpu.trace_stop"() : () -> ()
    "tpu.trace_start"() <{level = 10 : i32, message = "bkm,bmj->bkj"}> : () -> ()
    %cst_53 = arith.constant dense<0.000000e+00> : vector<2x8x8xf32>
    %177 = tpu.matmul %176, %173, %cst_53 {dimension_numbers = #tpu.dot_dimension_numbers<[2], [1], [1], [2], [0, 0, 0, 1, 1, 2], [0], [0]>} : vector<2x8x16xf32>, vector<2x16x8xf32>, vector<2x8x8xf32> -> vector<2x8x8xf32>
    "tpu.trace_stop"() : () -> ()
    %178 = arith.mulf %1, %1 : vector<2x16x16xf32>
    %cst_54 = arith.constant dense<0.000000e+00> : vector<2x16xf32>
    %179 = vector.multi_reduction <add>, %178, %cst_54 [2] : vector<2x16x16xf32> to vector<2x16xf32>
    %cst_55 = arith.constant dense<0.000000e+00> : vector<2xf32>
    %180 = vector.multi_reduction <add>, %179, %cst_55 [1] : vector<2x16xf32> to vector<2xf32>
    %181 = vector.shape_cast %180 : vector<2xf32> to vector<2x1xf32>
    %182 = tpu.iota {dimensions = array<i32: 0>} : vector<8x8xi32>
    %183 = tpu.iota {dimensions = array<i32: 1>} : vector<8x8xi32>
    %184 = arith.cmpi eq, %182, %183 : vector<8x8xi32>
    %185 = arith.extui %184 : vector<8x8xi1> to vector<8x8xi32>
    %186 = arith.sitofp %185 : vector<8x8xi32> to vector<8x8xf32>
    %187 = vector.shape_cast %186 : vector<8x8xf32> to vector<1x8x8xf32>
    %188 = vector.broadcast %187 : vector<1x8x8xf32> to vector<2x8x8xf32>
    %189 = arith.mulf %177, %188 : vector<2x8x8xf32>
    %cst_56 = arith.constant dense<0.000000e+00> : vector<2x8xf32>
    %190 = vector.multi_reduction <add>, %189, %cst_56 [2] : vector<2x8x8xf32> to vector<2x8xf32>
    %cst_57 = arith.constant dense<0.000000e+00> : vector<2xf32>
    %191 = vector.multi_reduction <add>, %190, %cst_57 [1] : vector<2x8xf32> to vector<2xf32>
    %192 = vector.shape_cast %191 : vector<2xf32> to vector<2x1xf32>
    "tpu.trace_start"() <{level = 10 : i32, message = "bnk,bnj->bkj"}> : () -> ()
    %cst_58 = arith.constant dense<0.000000e+00> : vector<2x8x8xf32>
    %193 = tpu.matmul %173, %173, %cst_58 {dimension_numbers = #tpu.dot_dimension_numbers<[1], [1], [2], [2], [0, 0, 0, 2, 1, 2], [0], [0]>} : vector<2x16x8xf32>, vector<2x16x8xf32>, vector<2x8x8xf32> -> vector<2x8x8xf32>
    "tpu.trace_stop"() : () -> ()
    %194 = arith.mulf %193, %193 : vector<2x8x8xf32>
    %cst_59 = arith.constant dense<0.000000e+00> : vector<2x8xf32>
    %195 = vector.multi_reduction <add>, %194, %cst_59 [2] : vector<2x8x8xf32> to vector<2x8xf32>
    %cst_60 = arith.constant dense<0.000000e+00> : vector<2xf32>
    %196 = vector.multi_reduction <add>, %195, %cst_60 [1] : vector<2x8xf32> to vector<2xf32>
    %197 = vector.shape_cast %196 : vector<2xf32> to vector<2x1xf32>
    %cst_61 = arith.constant 2.000000e+00 : f32
    %198 = vector.broadcast %cst_61 : f32 to vector<2x1xf32>
    %199 = arith.mulf %198, %192 : vector<2x1xf32>
    %200 = arith.subf %181, %199 : vector<2x1xf32>
    %201 = arith.addf %200, %197 : vector<2x1xf32>
    %cst_62 = arith.constant 0.000000e+00 : f32
    %202 = vector.broadcast %cst_62 : f32 to vector<2x1xf32>
    %203 = arith.maximumf %201, %202 : vector<2x1xf32>
    %cst_63 = arith.constant 0.000000e+00 : f32
    %204 = vector.broadcast %cst_63 : f32 to vector<2x16x8xf32>
    %205 = arith.subf %204, %173 : vector<2x16x8xf32>
    %cst_64 = arith.constant 1.000000e-15 : f32
    %206 = vector.broadcast %cst_64 : f32 to vector<2x16x8xf32>
    %207 = arith.addf %173, %206 : vector<2x16x8xf32>
    %208 = math.log %207 : vector<2x16x8xf32>
    %209 = arith.mulf %205, %208 : vector<2x16x8xf32>
    %cst_65 = arith.constant dense<0.000000e+00> : vector<2x16xf32>
    %210 = vector.multi_reduction <add>, %209, %cst_65 [2] : vector<2x16x8xf32> to vector<2x16xf32>
    %cst_66 = arith.constant dense<0.000000e+00> : vector<2xf32>
    %211 = vector.multi_reduction <add>, %210, %cst_66 [1] : vector<2x16xf32> to vector<2xf32>
    %212 = vector.shape_cast %211 : vector<2xf32> to vector<2x1xf32>
    %cst_67 = arith.constant 0.000000e+00 : f32
    %213 = vector.broadcast %cst_67 : f32 to vector<2x8x32xf32>
    %214 = tpu.concatenate %175, %213 in 2 : vector<2x8x96xf32>, vector<2x8x32xf32> -> vector<2x8x128xf32>
    %c0_68 = arith.constant 0 : index
    %c0_69 = arith.constant 0 : index
    %c0_70 = arith.constant 0 : index
    %215 = vector.load %arg12[%c0_68, %c0_69, %c0_70] : memref<2x8x128xf32, #tpu.memory_space<vmem>>, vector<2x8x128xf32>
    tpu.vector_store %arg12[%c0_68, %c0_69, %c0_70], %214 {strides = array<i32>} : memref<2x8x128xf32, #tpu.memory_space<vmem>>, vector<2x8x128xf32>,
    %216 = vector.extract_strided_slice %177 {offsets = [0, 0, 0], sizes = [2, 1, 8], strides = [1, 1, 1]} : vector<2x8x8xf32> to vector<2x1x8xf32>
    %217 = vector.shape_cast %216 : vector<2x1x8xf32> to vector<2x8xf32>
    %218 = vector.extract_strided_slice %177 {offsets = [0, 1, 0], sizes = [2, 1, 8], strides = [1, 1, 1]} : vector<2x8x8xf32> to vector<2x1x8xf32>
    %219 = vector.shape_cast %218 : vector<2x1x8xf32> to vector<2x8xf32>
    %220 = vector.extract_strided_slice %177 {offsets = [0, 2, 0], sizes = [2, 1, 8], strides = [1, 1, 1]} : vector<2x8x8xf32> to vector<2x1x8xf32>
    %221 = vector.shape_cast %220 : vector<2x1x8xf32> to vector<2x8xf32>
    %222 = vector.extract_strided_slice %177 {offsets = [0, 3, 0], sizes = [2, 1, 8], strides = [1, 1, 1]} : vector<2x8x8xf32> to vector<2x1x8xf32>
    %223 = vector.shape_cast %222 : vector<2x1x8xf32> to vector<2x8xf32>
    %224 = vector.extract_strided_slice %177 {offsets = [0, 4, 0], sizes = [2, 1, 8], strides = [1, 1, 1]} : vector<2x8x8xf32> to vector<2x1x8xf32>
    %225 = vector.shape_cast %224 : vector<2x1x8xf32> to vector<2x8xf32>
    %226 = vector.extract_strided_slice %177 {offsets = [0, 5, 0], sizes = [2, 1, 8], strides = [1, 1, 1]} : vector<2x8x8xf32> to vector<2x1x8xf32>
    %227 = vector.shape_cast %226 : vector<2x1x8xf32> to vector<2x8xf32>
    %228 = vector.extract_strided_slice %177 {offsets = [0, 6, 0], sizes = [2, 1, 8], strides = [1, 1, 1]} : vector<2x8x8xf32> to vector<2x1x8xf32>
    %229 = vector.shape_cast %228 : vector<2x1x8xf32> to vector<2x8xf32>
    %230 = vector.extract_strided_slice %177 {offsets = [0, 7, 0], sizes = [2, 1, 8], strides = [1, 1, 1]} : vector<2x8x8xf32> to vector<2x1x8xf32>
    %231 = vector.shape_cast %230 : vector<2x1x8xf32> to vector<2x8xf32>
    %cst_71 = arith.constant 0.000000e+00 : f32
    %232 = vector.broadcast %cst_71 : f32 to vector<2x62xf32>
    %233 = tpu.concatenate %217, %219, %221, %223, %225, %227, %229, %231, %203, %212, %232 in 1 : vector<2x8xf32>, vector<2x8xf32>, vector<2x8xf32>, vector<2x8xf32>, vector<2x8xf32>, vector<2x8xf32>, vector<2x8xf32>, vector<2x8xf32>, vector<2x1xf32>, vector<2x1xf32>, vector<2x62xf32> -> vector<2x128xf32>
    %c0_72 = arith.constant 0 : index
    %c0_73 = arith.constant 0 : index
    %234 = vector.load %arg13[%c0_72, %c0_73] : memref<2x128xf32, #tpu.memory_space<vmem>>, vector<2x128xf32>
    tpu.vector_store %arg13[%c0_72, %c0_73], %233 {strides = array<i32>} : memref<2x128xf32, #tpu.memory_space<vmem>>, vector<2x128xf32>,
    return
  }
  func.func @transform_0(%arg0: i32) -> (i32, i32) {
    %c0_i32 = arith.constant 0 : i32
    %c0_i32_0 = arith.constant 0 : i32
    %c0_i32_1 = arith.constant 0 : i32
    return %c0_i32, %c0_i32_0 : i32, i32
  }
  func.func @transform_1(%arg0: i32) -> (i32, i32, i32) {
    %c0_i32 = arith.constant 0 : i32
    %c0_i32_0 = arith.constant 0 : i32
    %c0_i32_1 = arith.constant 0 : i32
    %c0_i32_2 = arith.constant 0 : i32
    return %c0_i32, %c0_i32_0, %c0_i32_1 : i32, i32, i32
  }
  func.func @transform_2(%arg0: i32) -> (i32, i32) {
    %c0_i32 = arith.constant 0 : i32
    %c0_i32_0 = arith.constant 0 : i32
    %c0_i32_1 = arith.constant 0 : i32
    return %c0_i32, %c0_i32_0 : i32, i32
  }
  func.func @transform_3(%arg0: i32) -> (i32, i32) {
    %c0_i32 = arith.constant 0 : i32
    %c0_i32_0 = arith.constant 0 : i32
    %c0_i32_1 = arith.constant 0 : i32
    return %c0_i32, %c0_i32_0 : i32, i32
  }
  func.func @transform_4(%arg0: i32) -> (i32, i32, i32) {
    %c0_i32 = arith.constant 0 : i32
    %c0_i32_0 = arith.constant 0 : i32
    %c0_i32_1 = arith.constant 0 : i32
    %c0_i32_2 = arith.constant 0 : i32
    return %c0_i32, %c0_i32_0, %c0_i32_1 : i32, i32, i32
  }
  func.func @transform_5(%arg0: i32) -> (i32, i32) {
    %c0_i32 = arith.constant 0 : i32
    %c0_i32_0 = arith.constant 0 : i32
    %c0_i32_1 = arith.constant 0 : i32
    return %c0_i32, %c0_i32_0 : i32, i32
  }
  func.func @transform_6(%arg0: i32) -> (i32, i32) {
    %c0_i32 = arith.constant 0 : i32
    %c0_i32_0 = arith.constant 0 : i32
    %c0_i32_1 = arith.constant 0 : i32
    return %c0_i32, %c0_i32_0 : i32, i32
  }
  func.func @transform_7(%arg0: i32) -> (i32, i32) {
    %c0_i32 = arith.constant 0 : i32
    %c0_i32_0 = arith.constant 0 : i32
    %c0_i32_1 = arith.constant 0 : i32
    return %c0_i32, %c0_i32_0 : i32, i32
  }
  func.func @transform_8(%arg0: i32) -> (i32, i32) {
    %c0_i32 = arith.constant 0 : i32
    %c0_i32_0 = arith.constant 0 : i32
    %c0_i32_1 = arith.constant 0 : i32
    return %c0_i32, %c0_i32_0 : i32, i32
  }
  func.func @transform_9(%arg0: i32) -> (i32, i32) {
    %c0_i32 = arith.constant 0 : i32
    %c0_i32_0 = arith.constant 0 : i32
    %c0_i32_1 = arith.constant 0 : i32
    return %c0_i32, %c0_i32_0 : i32, i32
  }
  func.func @transform_10(%arg0: i32) -> (i32, i32) {
    %c0_i32 = arith.constant 0 : i32
    %c0_i32_0 = arith.constant 0 : i32
    %c0_i32_1 = arith.constant 0 : i32
    return %c0_i32, %c0_i32_0 : i32, i32
  }
  func.func @transform_11(%arg0: i32) -> (i32, i32, i32) {
    %c0_i32 = arith.constant 0 : i32
    %c0_i32_0 = arith.constant 0 : i32
    %c0_i32_1 = arith.constant 0 : i32
    %c0_i32_2 = arith.constant 0 : i32
    return %c0_i32, %c0_i32_0, %c0_i32_1 : i32, i32, i32
  }
  func.func @transform_12(%arg0: i32) -> (i32, i32) {
    %c0_i32 = arith.constant 0 : i32
    %c0_i32_0 = arith.constant 0 : i32
    %c0_i32_1 = arith.constant 0 : i32
    return %c0_i32, %c0_i32_0 : i32, i32
  }
}

</mosaic_0001>

<bundles_post_ra>
// kernel: tpu_custom_call.1
= control target key start
LH: loop header
LB: loop body
LE: loop exit
PB: predicated region body
PF: predicated region fallthrough
CT: control target
= control target key end

     0   :  { %18 = vsyncpa [#allocation3], 0  ;;  %vm106_vm0 = vcmask 130048   ;;  %s1528_s25 = smov 16   ;;  %s1529_s16 = smov 32   ;;  %s2264_s0 = inlined_call_operand.vmem [shape: f32[32,32], index: 0, kind: input, shape index: {}]   ;;  %s2265_s1 = inlined_call_operand.vmem [shape: f32[2,16,16], index: 1, kind: input, shape index: {}]   ;;  %s2266_s2 = inlined_call_operand.vmem [shape: f32[32,1], index: 2, kind: input, shape index: {}]   ;;  %s2267_s3 = inlined_call_operand.vmem [shape: f32[64,64], index: 3, kind: input, shape index: {}]   ;;  %s2268_s4 = inlined_call_operand.vmem [shape: f32[2,64,32], index: 4, kind: input, shape index: {}]   ;;  %s2269_s5 = inlined_call_operand.vmem [shape: f32[64,8], index: 5, kind: input, shape index: {}]   ;;  %s2270_s6 = inlined_call_operand.vmem [shape: f32[64,32], index: 6, kind: input, shape index: {}]   ;;  %s2271_s7 = inlined_call_operand.vmem [shape: f32[72,8], index: 7, kind: input, shape index: {}]   ;;  %s2272_s8 = inlined_call_operand.vmem [shape: f32[6,64], index: 8, kind: input, shape index: {}]   ;;  %s2273_s9 = inlined_call_operand.vmem [shape: f32[2,8], index: 9, kind: input, shape index: {}]   ;;  %s2274_s10 = inlined_call_operand.vmem [shape: f32[1,32], index: 10, kind: input, shape index: {}]   ;;  %s2275_s11 = inlined_call_operand.hbm [shape: f32[2,8,128], index: 11, kind: output, shape index: {0}]   ;;  %s2276_s12 = inlined_call_operand.hbm [shape: f32[2,128], index: 12, kind: output, shape index: {1}]  }
   0x1   :  { %v1610_v0 = vld [vmem:[%s2265_s1 + $0x10] sm:$0xff]  ;;  %v45_v1 = vld [vmem:[%s2264_s0 + $0x18] sm:$0xff]  ;;  %v42_v3 = vld [vmem:[%s2264_s0] sm:$0xff] }
   0x2   :  { %129 = vrot.lane.b32.xlu0 %v1610_v0, %s1528_s25  ;;  %162 = vmatpush.msra.mxu0 %v45_v1  ;;  %v44_v2 = vld [vmem:[%s2264_s0 + $0x10] sm:$0xff]  ;;  %v43_v4 = vld [vmem:[%s2264_s0 + $0x8] sm:$0xff]  ;;  %v46_v5 = vld [vmem:[%s2265_s1] sm:$0xff] }
   0x3   :  { %187 = vrot.lane.b32.xlu2 %v42_v3, %s1529_s16  ;;  %v1631_v6 = vsel %vm106_vm0, %v46_v5, 0.0 }
   0x4   :  { %163 = vmatpush.msra.mxu0 %v44_v2 }
   0x5   :  { %19 = vsyncpa [#allocation5], 0  ;;  %108 = vadd.xlane.f32.xlu1 %v1631_v6  ;;  %vm137_vm1 = vcmask 261120   ;;  %v1637_v7 = vld [vmem:[%s2265_s1 + $0x18] sm:$0xff]  ;;  %v47_v8 = vld [vmem:[%s2265_s1 + $0x8] sm:$0xff]  ;;  %v113_v11 = vsel %vm106_vm0, %v1610_v0, 0.0 }
   0x6   :  { %164 = vmatpush.msra.mxu0 %v43_v4  ;;  %v1647_v9 = vsel %vm106_vm0, %v47_v8, 0.0  ;;  %v116_v10 = vsel %vm106_vm0, %v1637_v7, 0.0  ;;  %v61_v12 = vld [vmem:[%s2267_s3 + $0x38] sm:$0xff]  ;;  %v60_v13 = vld [vmem:[%s2267_s3 + $0x30] sm:$0xff]  ;;  %v59_v14 = vld [vmem:[%s2267_s3 + $0x28] sm:$0xff]  ;;  %v1530_v21 = vmov 0  }
   0x7   :  { %225 = vmatpush.msra.mxu1 %v61_v12  ;;  %v58_v15 = vld [vmem:[%s2267_s3 + $0x20] sm:$0xff]  ;;  %v57_v16 = vld [vmem:[%s2267_s3 + $0x18] sm:$0xff]  ;;  %v56_v17 = vld [vmem:[%s2267_s3 + $0x10] sm:$0xff]  ;;  %1432 = vset.pattern.permute.xlu0 %v1530_v21  ;;  %vm204_vm2 = vcmask 523264   ;;  %s1532_s26 = smov 64   ;;  %vm776_vm9 = vcmask 588800  }
   0x8   :  { %165 = vmatpush.msra.mxu0 %v42_v3  ;;  %v55_v18 = vld [vmem:[%s2267_s3 + $0x8] sm:$0xff]  ;;  %v54_v19 = vld [vmem:[%s2267_s3] sm:$0xff]  ;;  %1433 = vset.pattern.permute.xlu1 %v1530_v21  ;;  %v52_v41 = vld [vmem:[%s2266_s2 + $0x10] sm:$0xff]  ;;  %vm818_vm10 = vcmask 64512   ;;  %vm1128_vm11 = vcmask 130112   ;;  %vm1133_vm12 = vcmask 1041409  }
   0x9   :  { %1373 = vmatmul.msk.f32.vlgmr.msra.gmra.mxu0 %vm137_vm1, %v1631_v6  ;;  %226 = vmatpush.msra.mxu1 %v60_v13  ;;  %v50_v20 = vld [vmem:[%s2266_s2] sm:$0xff]  ;;  %v51_v25 = vld [vmem:[%s2266_s2 + $0x8] sm:$0xff]  ;;  %v53_v45 = vld [vmem:[%s2266_s2 + $0x18] sm:$0xff]  ;;  %vm1136_vm13 = vcmask 123904   ;;  %vm1271_vm14 = vcmask 785408   ;;  %s1537_s19 = smov 40  }
   0xa   :  { %131 = vrot.lane.b32.xlu0 %v1637_v7, %s1528_s25  ;;  %1434 = vset.pattern.permute.xlu2 %v1530_v21  ;;  %v1730_v59 = vld [vmem:[%s2272_s8] sm:$0x3f]  ;;  %s1531_s8 = smov 96   ;;  %s1538_s20 = smov 48  }
   0xb   :  { %227 = vmatpush.msra.mxu1 %v59_v14  ;;  %v203_v60 = vperm.slane %v1730_v59, 0  ;;  %s1345_s3 = sshll.u32 %s2275_s11, 4  ;;  %s1539_s21 = smov [#allocation2]   ;;  %s1346_s3 = int_to_ptr.hbm [resolvable:$true] %s1345_s3 }
   0xc   :  { %s1540_s22 = smov 128   ;;  %s1541_s11 = smov [#allocation4]  }
   0xd   :  { %111 = vadd.xlane.f32.xlu1 %v1647_v9  ;;  %228 = vmatpush.msra.mxu1 %v58_v15  ;;  %s1359_s24 = sshll.u32 %s2276_s12, 4  ;;  %s1360_s24 = int_to_ptr.hbm [resolvable:$true] %s1359_s24 }
   0xf   :  { %229 = vmatpush.msra.mxu1 %v57_v16 }
  0x11   :  { %1374 = vmatmul.msk.f32.gmra.mxu0 %vm137_vm1, %v1647_v9  ;;  %230 = vmatpush.msra.mxu1 %v56_v17 }
  0x12   :  { %189 = vrot.lane.b32.xlu0 %v43_v4, %s1529_s16 }
  0x13   :  { %231 = vmatpush.msra.mxu1 %v55_v18 }
  0x15   :  { %117 = vadd.xlane.f32.xlu1 %v116_v10  ;;  %232 = vmatpush.msra.mxu1 %v54_v19 }
  0x1a   :  { %191 = vrot.lane.b32.xlu0 %v44_v2, %s1529_s16 }
  0x22   :  { %248 = vperm.xlu0 %1432, %v50_v20  }
  0x2a   :  { %253 = vperm.xlu0 %1432, %v51_v25  }
  0x2c   :  { %114 = vadd.xlane.f32.xlu2 %v113_v11 }
  0x2e   :  { %193 = vrot.lane.b32.xlu1 %v45_v1, %s1529_s16 }
  0x36   :  { %258 = vperm.xlu1 %1433, %v52_v41  }
  0x44   :  { %263 = vperm.xlu2 %1434, %v53_v45  }
  0x5d   :  { %v188_v33 = vpop.permute.xlu2 %187 }
  0x74   :  { %v130_v22 = vpop.permute.xlu0 %129 }
  0x75   :  { %v1687_v23 = vsel %vm106_vm0, 0.0, %v130_v22 }
  0x76   :  { %1375 = vmatmul.msk.f32.gmra.mxu0 %vm137_vm1, %v1687_v23 }
  0x78   :  { %v109_v24 = vpop.xlane.xlu1 %108 }
  0x79   :  { %v119_v26 = vmax.f32 %v109_v24, 1.0 }
  0x7b   :  { %1436 = vrcp.f32 %v119_v26 }
  0x7c   :  { %v132_v27 = vpop.permute.xlu0 %131 }
  0x7d   :  { %v1695_v28 = vsel %vm106_vm0, 0.0, %v132_v27 }
  0x7e   :  { %1376 = vmatmul.msk.f32.gmra.mxu0 %vm137_vm1, %v1695_v28 }
  0x80   :  { %v112_v29 = vpop.xlane.xlu1 %111 }
  0x81   :  { %v120_v30 = vmax.f32 %v112_v29, 1.0  ;;  %v1699_v31 = vpop.eup %1436 }
  0x83   :  { %1438 = vrcp.f32 %v120_v30 }
  0x84   :  { %v190_v38 = vpop.permute.xlu0 %189 }
  0x86   :  { %v167_v32 = vpop.f32.mrf.mxu0 }
  0x87   :  { %v179_v34 = vmul.f32 %v1699_v31, %v167_v32 }
  0x88   :  { %v118_v44 = vpop.xlane.xlu1 %117 }
  0x89   :  { %v199_v35 = vsel %vm137_vm1, %v179_v34, %v188_v33  ;;  %v1704_v36 = vpop.eup %1438  ;;  %v122_v47 = vmax.f32 %v118_v44, 1.0 }
  0x8a   :  { %1377 = vmatmul.msk.f32.vlgmr.msra.gmra.mxu1 %vm204_vm2, %v199_v35 }
  0x8c   :  { %v192_v49 = vpop.permute.xlu0 %191 }
  0x8e   :  { %v170_v37 = vpop.f32.mrf.mxu0 }
  0x8f   :  { %v180_v39 = vmul.f32 %v1704_v36, %v170_v37 }
  0x91   :  { %v200_v40 = vsel %vm137_vm1, %v180_v39, %v190_v38 }
  0x92   :  { %1378 = vmatmul.msk.f32.gmra.mxu1 %vm204_vm2, %v200_v40 }
  0x94   :  { %v1725_v58 = vpop.permute.xlu0 %248 }
  0x9c   :  { %v1733_v1 = vpop.permute.xlu0 %253 }
  0x9f   :  { %v115_v42 = vpop.xlane.xlu2 %114 }
  0xa0   :  { %v121_v43 = vmax.f32 %v115_v42, 1.0  ;;  %v194_v54 = vpop.permute.xlu1 %193 }
  0xa2   :  { %1440 = vrcp.f32 %v121_v43 }
  0xa3   :  { %1442 = vrcp.f32 %v122_v47 }
  0xa7   :  { %v1748_v17 = vpop.permute.xlu2 %263 }
  0xa8   :  { %v1715_v46 = vpop.eup %1440  ;;  %v1737_v5 = vpop.permute.xlu1 %258 }
  0xa9   :  { %v1720_v52 = vpop.eup %1442 }
  0xf3   :  { %v173_v48 = vpop.f32.mrf.mxu0 }
  0xf4   :  { %v181_v50 = vmul.f32 %v1715_v46, %v173_v48 }
  0xf6   :  { %v201_v51 = vsel %vm137_vm1, %v181_v50, %v192_v49 }
  0xf7   :  { %1379 = vmatmul.msk.f32.gmra.mxu1 %vm204_vm2, %v201_v51 }
  0xfb   :  { %v176_v53 = vpop.f32.mrf.mxu0 }
  0xfc   :  { %v182_v55 = vmul.f32 %v1720_v52, %v176_v53 }
  0xfe   :  { %v202_v56 = vsel %vm137_vm1, %v182_v55, %v194_v54 }
  0xff   :  { %1380 = vmatmul.msk.f32.gmra.mxu1 %vm204_vm2, %v202_v56 }
 0x107   :  { %v234_v57 = vpop.f32.mrf.mxu1 }
 0x108   :  { %v235_v62 = vadd.f32 %v234_v57, %v203_v60 }
 0x10a   :  { %v266_v2 = vmul.f32 %v1725_v58, %v235_v62 }
 0x10c   :  { %v1739_v10 = vmax.f32 %v266_v2, 0.0 }
 0x10e   :  { %v287_v14 = vmul.f32 %v1739_v10, %v1739_v10  ;;  %v274_v18 = vsel %vm204_vm2, %v1739_v10, 0.0 }
 0x10f   :  { %v237_v61 = vpop.f32.mrf.mxu1 }
 0x110   :  { %v238_v63 = vadd.f32 %v237_v61, %v203_v60  ;;  %v291_v22 = vsel %vm204_vm2, %v287_v14, 0.0 }
 0x112   :  { %v267_v3 = vmul.f32 %v1733_v1, %v238_v63 }
 0x114   :  { %v1741_v11 = vmax.f32 %v267_v3, 0.0 }
 0x116   :  { %v288_v15 = vmul.f32 %v1741_v11, %v1741_v11  ;;  %v275_v19 = vsel %vm204_vm2, %v1741_v11, 0.0 }
 0x117   :  { %v276_v27 = vadd.f32 %v275_v19, %v274_v18  ;;  %v330_v19 = vperm.slane %v1730_v59, 2 }
 0x118   :  { %v292_v24 = vsel %vm204_vm2, %v288_v15, 0.0 }
 0x119   :  { %v293_v32 = vadd.f32 %v292_v24, %v291_v22 }
 0x174   :  { %v240_v4 = vpop.f32.mrf.mxu1 }
 0x175   :  { %v241_v8 = vadd.f32 %v240_v4, %v203_v60 }
 0x177   :  { %v268_v12 = vmul.f32 %v1737_v5, %v241_v8 }
 0x179   :  { %v272_v13 = vmax.f32 %v268_v12, 0.0 }
 0x17b   :  { %v289_v20 = vmul.f32 %v272_v13, %v272_v13  ;;  %v277_v25 = vsel %vm204_vm2, %v272_v13, 0.0 }
 0x17c   :  { %v243_v16 = vpop.f32.mrf.mxu1  ;;  %v278_v33 = vadd.f32 %v277_v25, %v276_v27 }
 0x17d   :  { %v244_v21 = vadd.f32 %v243_v16, %v203_v60  ;;  %v294_v29 = vsel %vm204_vm2, %v289_v20, 0.0 }
 0x17e   :  { %v295_v37 = vadd.f32 %v294_v29, %v293_v32 }
 0x17f   :  { %v269_v26 = vmul.f32 %v1748_v17, %v244_v21 }
 0x181   :  { %v273_v30 = vmax.f32 %v269_v26, 0.0 }
 0x183   :  { %v279_v34 = vsel %vm204_vm2, %v273_v30, 0.0  ;;  %v290_v35 = vmul.f32 %v273_v30, %v273_v30 }
 0x184   :  { %v280_v38 = vadd.f32 %v279_v34, %v278_v33  ;;  %v77_v33 = vld [vmem:[%s2268_s4 + $0x78] sm:$0xff]  ;;  %v76_v34 = vld [vmem:[%s2268_s4 + $0x70] sm:$0xff] }
 0x185   :  { %v296_v39 = vsel %vm204_vm2, %v290_v35, 0.0  ;;  %469 = vmatpush.msrb.mxu0 %v77_v33  ;;  %v75_v35 = vld [vmem:[%s2268_s4 + $0x68] sm:$0xff] }
 0x186   :  { %v281_v40 = vrot.slane %v280_v38, 4  ;;  %v297_v41 = vadd.f32 %v296_v39, %v295_v37  ;;  %v74_v37 = vld [vmem:[%s2268_s4 + $0x60] sm:$0xff] }
 0x187   :  { %470 = vmatpush.msrb.mxu0 %v76_v34 }
 0x188   :  { %v282_v42 = vadd.f32 %v281_v40, %v280_v38  ;;  %v298_v43 = vrot.slane %v297_v41, 4  ;;  %v73_v40 = vld [vmem:[%s2268_s4 + $0x58] sm:$0xff] }
 0x189   :  { %471 = vmatpush.msrb.mxu0 %v75_v35  ;;  %v510_v35 = vperm.slane %v1730_v59, 3 }
 0x18a   :  { %v283_v44 = vrot.slane %v282_v42, 2  ;;  %v299_v45 = vadd.f32 %v298_v43, %v297_v41  ;;  %v72_v41 = vld [vmem:[%s2268_s4 + $0x50] sm:$0xff] }
 0x18b   :  { %472 = vmatpush.msrb.mxu0 %v74_v37 }
 0x18c   :  { %v284_v47 = vadd.f32 %v283_v44, %v282_v42  ;;  %v300_v48 = vrot.slane %v299_v45, 2  ;;  %v71_v42 = vld [vmem:[%s2268_s4 + $0x48] sm:$0xff] }
 0x18d   :  { %473 = vmatpush.msrb.mxu0 %v73_v40 }
 0x18e   :  { %v285_v49 = vrot.slane %v284_v47, 1  ;;  %v301_v50 = vadd.f32 %v300_v48, %v299_v45  ;;  %v70_v48 = vld [vmem:[%s2268_s4 + $0x40] sm:$0xff] }
 0x18f   :  { %474 = vmatpush.msrb.mxu0 %v72_v41 }
 0x190   :  { %v286_v51 = vadd.f32 %v285_v49, %v284_v47  ;;  %v302_v53 = vrot.slane %v301_v50, 1  ;;  %v69_v49 = vld [vmem:[%s2268_s4 + $0x38] sm:$0xff] }
 0x191   :  { %475 = vmatpush.msrb.mxu0 %v71_v42  ;;  %408 = vmatpush.msra.mxu3 %v69_v49 }
 0x192   :  { %v303_v54 = vadd.f32 %v302_v53, %v301_v50  ;;  %v304_v55 = vmul.f32 0.03125, %v286_v51  ;;  %v68_v50 = vld [vmem:[%s2268_s4 + $0x30] sm:$0xff]  ;;  %v67_v51 = vld [vmem:[%s2268_s4 + $0x28] sm:$0xff]  ;;  %v66_v53 = vld [vmem:[%s2268_s4 + $0x20] sm:$0xff] }
 0x193   :  { %476 = vmatpush.msrb.mxu0 %v70_v48  ;;  %409 = vmatpush.msra.mxu3 %v68_v50 }
 0x194   :  { %v305_v56 = vmul.f32 0.03125, %v303_v54  ;;  %v306_v57 = vmul.f32 %v304_v55, %v304_v55  ;;  %v324_v16 = vsub.f32 %v273_v30, %v304_v55  ;;  %v323_v20 = vsub.f32 %v272_v13, %v304_v55  ;;  %v65_v54 = vld [vmem:[%s2268_s4 + $0x18] sm:$0xff] }
 0x195   :  { %v322_v24 = vsub.f32 %v1741_v11, %v304_v55  ;;  %v321_v29 = vsub.f32 %v1739_v10, %v304_v55  ;;  %410 = vmatpush.msra.mxu3 %v67_v51  ;;  %v64_v55 = vld [vmem:[%s2268_s4 + $0x10] sm:$0xff] }
 0x196   :  { %v307_v60 = vsub.f32 %v305_v56, %v306_v57  ;;  %v63_v56 = vld [vmem:[%s2268_s4 + $0x8] sm:$0xff]  ;;  %v62_v57 = vld [vmem:[%s2268_s4] sm:$0xff]  ;;  %s1343_s4 = sshll.u32 %s1539_s21, 4  ;;  %s1344_s4 = int_to_ptr.vmem [resolvable:$true] %s1343_s4 }
 0x197   :  { %411 = vmatpush.msra.mxu3 %v66_v53 }
 0x198   :  { %v308_v61 = vmax.f32 %v307_v60, 0.0 }
 0x199   :  { %412 = vmatpush.msra.mxu3 %v65_v54 }
 0x19a   :  { %v309_v62 = vadd.f32 1e-05, %v308_v61 }
 0x19b   :  { %413 = vmatpush.msra.mxu3 %v64_v55 }
 0x19c   :  { %1444 = vrsqrt.f32 %v309_v62  ;;  %vm316_vm4 = vweird.f32 %v309_v62 }
 0x19d   :  { %414 = vmatpush.msra.mxu3 %v63_v56 }
 0x19f   :  { %415 = vmatpush.msra.mxu3 %v62_v57 }
 0x1a2   :  { %v1445_v63 = vpop.eup %1444 }
 0x1a3   :  { %v311_v2 = vmul.f32 %v1445_v63, %v309_v62  ;;  %vm317_vm3 = vweird.f32 %v1445_v63 }
 0x1a4   :  { %vm318_vm5 = vmor %vm316_vm4, %vm317_vm3  ;;  %vm1159_vm3 = vcmask 58368   ;;  %vm1324_vm4 = vcmask 195584  }
 0x1a5   :  { %v312_v3 = vmul.f32 %v1445_v63, %v311_v2 }
 0x1a7   :  { %v313_v4 = vmul.f32 0.5, %v312_v3 }
 0x1a9   :  { %v314_v8 = vsub.f32 1.5, %v313_v4 }
 0x1ab   :  { %v315_v12 = vmul.f32 %v1445_v63, %v314_v8 }
 0x1ad   :  { %v319_v14 = vsel %vm318_vm5, %v1445_v63, %v315_v12  ;;  %vm1327_vm5 = vcmask 326656  }
 0x1ae   :  { %v320_v15 = vmul.f32 %v319_v14, %v1730_v59 }
 0x1b0   :  { %v325_v18 = vperm.slane %v320_v15, 1 }
 0x1b2   :  { %v329_v21 = vmul.f32 %v325_v18, %v324_v16  ;;  %v328_v22 = vmul.f32 %v325_v18, %v323_v20  ;;  %v327_v27 = vmul.f32 %v325_v18, %v322_v24  ;;  %v326_v30 = vmul.f32 %v325_v18, %v321_v29 }
 0x1b4   :  { %v1764_v25 = vadd.f32 %v330_v19, %v329_v21  ;;  %v1766_v26 = vadd.f32 %v330_v19, %v328_v22  ;;  %v1773_v13 = vadd.f32 %v330_v19, %v327_v27  ;;  %v1776_v11 = vadd.f32 %v330_v19, %v326_v30 }
 0x1b6   :  { %347 = vmatpush.msra.mxu2 %v1764_v25  ;;  %376 = vrot.lane.b32.xlu2 %v1766_v26, %s1529_s16 }
 0x1b8   :  { %348 = vmatpush.msra.mxu2 %v1766_v26 }
 0x1ba   :  { %349 = vmatpush.msra.mxu2 %v1773_v13 }
 0x1bc   :  { %350 = vmatpush.msra.mxu2 %v1776_v11 }
 0x1bd   :  { %1381 = vmatmul.msk.f32.vlgmr.msra.gmra.mxu2 %vm137_vm1, %v1631_v6 }
 0x1c5   :  { %1382 = vmatmul.msk.f32.gmra.mxu2 %vm137_vm1, %v1647_v9 }
 0x1cd   :  { %1383 = vmatmul.msk.f32.gmra.mxu2 %vm137_vm1, %v1687_v23 }
 0x1d5   :  { %1384 = vmatmul.msk.f32.gmra.mxu2 %vm137_vm1, %v1695_v28 }
 0x210   :  { %v377_v18 = vpop.permute.xlu2 %376 }
 0x240   :  { %v352_v10 = vpop.f32.mrf.mxu2 }
 0x241   :  { %v364_v32 = vmul.f32 %v1699_v31, %v352_v10 }
 0x243   :  { %433 = vrot.lane.b32.xlu0 %v364_v32, %s1531_s8 }
 0x248   :  { %v355_v38 = vpop.f32.mrf.mxu2 }
 0x249   :  { %v365_v39 = vmul.f32 %v1704_v36, %v355_v38 }
 0x24b   :  { %435 = vrot.lane.b32.xlu1 %v365_v39, %s1531_s8 }
 0x250   :  { %v358_v43 = vpop.f32.mrf.mxu2 }
 0x251   :  { %v366_v44 = vmul.f32 %v1715_v46, %v358_v43 }
 0x253   :  { %437 = vrot.lane.b32.xlu0 %v366_v44, %s1531_s8  ;;  %v386_v19 = vsel %vm137_vm1, %v366_v44, %v377_v18 }
 0x258   :  { %v361_v45 = vpop.f32.mrf.mxu2 }
 0x259   :  { %v367_v47 = vmul.f32 %v1720_v52, %v361_v45 }
 0x25b   :  { %372 = vrot.lane.b32.xlu0 %v1776_v11, %s1529_s16  ;;  %439 = vrot.lane.b32.xlu1 %v367_v47, %s1531_s8 }
 0x263   :  { %378 = vrot.lane.b32.xlu0 %v1764_v25, %s1529_s16  ;;  %374 = vrot.lane.b32.xlu1 %v1773_v13, %s1529_s16 }
 0x2b5   :  { %v434_v60 = vpop.permute.xlu0 %433 }
 0x2b6   :  { %v445_v61 = vsel %vm137_vm1, %v434_v60, %v1776_v11 }
 0x2b7   :  { %1389 = vmatmul.msk.f32.vlgmr.msrb.gmra.mxu0 %vm204_vm2, %v445_v61 }
 0x2bd   :  { %v436_v62 = vpop.permute.xlu1 %435 }
 0x2be   :  { %v446_v63 = vsel %vm137_vm1, %v436_v62, %v1773_v13 }
 0x2bf   :  { %1390 = vmatmul.msk.f32.gmra.mxu0 %vm204_vm2, %v446_v63 }
 0x2c5   :  { %v438_v2 = vpop.permute.xlu0 %437 }
 0x2c6   :  { %v447_v3 = vsel %vm137_vm1, %v438_v2, %v1766_v26 }
 0x2c7   :  { %1391 = vmatmul.msk.f32.gmra.mxu0 %vm204_vm2, %v447_v3 }
 0x2cd   :  { %v373_v4 = vpop.permute.xlu0 %372  ;;  %v440_v8 = vpop.permute.xlu1 %439 }
 0x2ce   :  { %v384_v12 = vsel %vm137_vm1, %v364_v32, %v373_v4  ;;  %v448_v14 = vsel %vm137_vm1, %v440_v8, %v1764_v25 }
 0x2cf   :  { %1385 = vmatmul.msk.f32.vlgmr.msra.gmra.mxu3 %vm204_vm2, %v384_v12  ;;  %1392 = vmatmul.msk.f32.gmra.mxu0 %vm204_vm2, %v448_v14 }
 0x2d5   :  { %v375_v15 = vpop.permute.xlu1 %374  ;;  %v379_v20 = vpop.permute.xlu0 %378 }
 0x2d6   :  { %v385_v16 = vsel %vm137_vm1, %v365_v39, %v375_v15  ;;  %v387_v21 = vsel %vm137_vm1, %v367_v47, %v379_v20 }
 0x2d7   :  { %1386 = vmatmul.msk.f32.gmra.mxu3 %vm204_vm2, %v385_v16 }
 0x2df   :  { %1387 = vmatmul.msk.f32.gmra.mxu3 %vm204_vm2, %v386_v19 }
 0x2e7   :  { %1388 = vmatmul.msk.f32.gmra.mxu3 %vm204_vm2, %v387_v21 }
 0x334   :  { %v478_v22 = vpop.f32.mrf.mxu0 }
 0x335   :  { %494 = vrot.lane.b32.xlu1 %v478_v22, %s1529_s16 }
 0x33c   :  { %v481_v24 = vpop.f32.mrf.mxu0 }
 0x33d   :  { %496 = vrot.lane.b32.xlu2 %v481_v24, %s1529_s16 }
 0x344   :  { %v484_v27 = vpop.f32.mrf.mxu0 }
 0x345   :  { %498 = vrot.lane.b32.xlu0 %v484_v27, %s1529_s16 }
 0x34c   :  { %v487_v29 = vpop.f32.mrf.mxu0 }
 0x34d   :  { %500 = vrot.lane.b32.xlu1 %v487_v29, %s1529_s16 }
 0x352   :  { %v417_v30 = vpop.f32.mrf.mxu3 }
 0x35a   :  { %v420_v10 = vpop.f32.mrf.mxu3 }
 0x362   :  { %v423_v39 = vpop.f32.mrf.mxu3 }
 0x36a   :  { %v426_v51 = vpop.f32.mrf.mxu3 }
 0x397   :  { %v497_v33 = vpop.permute.xlu2 %496 }
 0x398   :  { %v507_v37 = vsel %vm137_vm1, %v420_v10, %v497_v33 }
 0x399   :  { %v512_v40 = vadd.f32 %v510_v35, %v507_v37 }
 0x39b   :  { %v516_v44 = vmul.f32 %v512_v40, %v1733_v1 }
 0x39d   :  { %v1882_v49 = vmax.f32 %v516_v44, 0.0 }
 0x39f   :  { %v537_v56 = vmul.f32 %v1882_v49, %v1882_v49  ;;  %v524_v62 = vsel %vm204_vm2, %v1882_v49, 0.0 }
 0x3a1   :  { %v541_v8 = vsel %vm204_vm2, %v537_v56, 0.0 }
 0x3a7   :  { %v495_v32 = vpop.permute.xlu1 %494 }
 0x3a8   :  { %v506_v34 = vsel %vm137_vm1, %v417_v30, %v495_v32 }
 0x3a9   :  { %v511_v38 = vadd.f32 %v510_v35, %v506_v34 }
 0x3ab   :  { %v515_v41 = vmul.f32 %v511_v38, %v1725_v58 }
 0x3ad   :  { %v1879_v47 = vmax.f32 %v515_v41, 0.0 }
 0x3af   :  { %v536_v53 = vmul.f32 %v1879_v47, %v1879_v47  ;;  %v523_v57 = vsel %vm204_vm2, %v1879_v47, 0.0 }
 0x3b0   :  { %v525_v4 = vadd.f32 %v524_v62, %v523_v57 }
 0x3b1   :  { %v540_v63 = vsel %vm204_vm2, %v536_v53, 0.0 }
 0x3b2   :  { %v542_v15 = vadd.f32 %v541_v8, %v540_v63  ;;  %v579_v63 = vperm.slane %v1730_v59, 5 }
 0x3b7   :  { %v499_v42 = vpop.permute.xlu0 %498 }
 0x3b8   :  { %v508_v43 = vsel %vm137_vm1, %v423_v39, %v499_v42 }
 0x3b9   :  { %v513_v45 = vadd.f32 %v510_v35, %v508_v43 }
 0x3bb   :  { %v517_v48 = vmul.f32 %v513_v45, %v1737_v5 }
 0x3bd   :  { %v1884_v50 = vmax.f32 %v517_v48, 0.0 }
 0x3bf   :  { %v501_v54 = vpop.permute.xlu1 %500  ;;  %v538_v60 = vmul.f32 %v1884_v50, %v1884_v50  ;;  %v526_v2 = vsel %vm204_vm2, %v1884_v50, 0.0 }
 0x3c0   :  { %v509_v55 = vsel %vm137_vm1, %v426_v51, %v501_v54  ;;  %v527_v16 = vadd.f32 %v526_v2, %v525_v4 }
 0x3c1   :  { %v514_v61 = vadd.f32 %v510_v35, %v509_v55  ;;  %v543_v12 = vsel %vm204_vm2, %v538_v60, 0.0 }
 0x3c2   :  { %v544_v20 = vadd.f32 %v543_v12, %v542_v15 }
 0x3c3   :  { %v518_v3 = vmul.f32 %v514_v61, %v1748_v17 }
 0x3c5   :  { %v522_v14 = vmax.f32 %v518_v3, 0.0 }
 0x3c7   :  { %v528_v18 = vsel %vm204_vm2, %v522_v14, 0.0  ;;  %v539_v19 = vmul.f32 %v522_v14, %v522_v14 }
 0x3c8   :  { %v529_v21 = vadd.f32 %v528_v18, %v527_v16 }
 0x3c9   :  { %v545_v22 = vsel %vm204_vm2, %v539_v19, 0.0 }
 0x3ca   :  { %v530_v24 = vrot.slane %v529_v21, 4  ;;  %v546_v27 = vadd.f32 %v545_v22, %v544_v20 }
 0x3cc   :  { %v531_v29 = vadd.f32 %v530_v24, %v529_v21  ;;  %v547_v30 = vrot.slane %v546_v27, 4 }
 0x3ce   :  { %v532_v10 = vrot.slane %v531_v29, 2  ;;  %v548_v32 = vadd.f32 %v547_v30, %v546_v27 }
 0x3d0   :  { %v533_v33 = vadd.f32 %v532_v10, %v531_v29  ;;  %v549_v34 = vrot.slane %v548_v32, 2 }
 0x3d2   :  { %v534_v35 = vrot.slane %v533_v33, 1  ;;  %v550_v37 = vadd.f32 %v549_v34, %v548_v32 }
 0x3d4   :  { %v535_v38 = vadd.f32 %v534_v35, %v533_v33  ;;  %v551_v39 = vrot.slane %v550_v37, 1 }
 0x3d6   :  { %v552_v40 = vadd.f32 %v551_v39, %v550_v37  ;;  %v553_v41 = vmul.f32 0.03125, %v535_v38 }
 0x3d8   :  { %v554_v42 = vmul.f32 0.03125, %v552_v40  ;;  %v555_v43 = vmul.f32 %v553_v41, %v553_v41  ;;  %v573_v62 = vsub.f32 %v522_v14, %v553_v41  ;;  %v572_v3 = vsub.f32 %v1884_v50, %v553_v41  ;;  %v78_v50 = vld [vmem:[%s2269_s5] sm:$0xff] }
 0x3d9   :  { %v571_v4 = vsub.f32 %v1882_v49, %v553_v41  ;;  %v570_v8 = vsub.f32 %v1879_v47, %v553_v41  ;;  %v83_v47 = vld [vmem:[%s2269_s5 + $0x28] sm:$0xff] }
 0x3da   :  { %v556_v44 = vsub.f32 %v554_v42, %v555_v43  ;;  %v79_v49 = vld [vmem:[%s2269_s5 + $0x8] sm:$0xff]  ;;  %v101_v42 = vld [vmem:[%s2271_s7 + $0x38] sm:$0xff]  ;;  %v100_v43 = vld [vmem:[%s2271_s7 + $0x30] sm:$0xff] }
 0x3dc   :  { %v557_v45 = vmax.f32 %v556_v44, 0.0 }
 0x3de   :  { %v558_v48 = vadd.f32 1e-05, %v557_v45 }
 0x3e0   :  { %1446 = vrsqrt.f32 %v558_v48  ;;  %vm565_vm7 = vweird.f32 %v558_v48 }
 0x3e6   :  { %v1447_v51 = vpop.eup %1446 }
 0x3e7   :  { %v560_v53 = vmul.f32 %v1447_v51, %v558_v48  ;;  %vm566_vm6 = vweird.f32 %v1447_v51  ;;  %v99_v48 = vld [vmem:[%s2271_s7 + $0x28] sm:$0xff] }
 0x3e8   :  { %vm567_vm8 = vmor %vm565_vm7, %vm566_vm6  ;;  %vm1329_vm6 = vcmask 392192   ;;  %vm1331_vm7 = vcmask 457728  }
 0x3e9   :  { %v561_v54 = vmul.f32 %v1447_v51, %v560_v53 }
 0x3eb   :  { %v562_v55 = vmul.f32 0.5, %v561_v54 }
 0x3ed   :  { %v563_v56 = vsub.f32 1.5, %v562_v55 }
 0x3ef   :  { %v564_v57 = vmul.f32 %v1447_v51, %v563_v56 }
 0x3f1   :  { %v568_v60 = vsel %vm567_vm8, %v1447_v51, %v564_v57  ;;  %vm1334_vm8 = vcmask 531456  }
 0x3f2   :  { %v569_v61 = vmul.f32 %v568_v60, %v1730_v59  ;;  %v85_v59 = vld [vmem:[%s2269_s5 + $0x38] sm:$0xff] }
 0x3f3   :  { %658 = vmatpush.msrb.mxu1 %v85_v59  ;;  %v90_v59 = vld [vmem:[%s2270_s6 + $0x20] sm:$0xff] }
 0x3f4   :  { %v574_v2 = vperm.slane %v569_v61, 4 }
 0x3f6   :  { %v578_v12 = vmul.f32 %v574_v2, %v573_v62  ;;  %v577_v15 = vmul.f32 %v574_v2, %v572_v3  ;;  %v576_v16 = vmul.f32 %v574_v2, %v571_v4  ;;  %v575_v18 = vmul.f32 %v574_v2, %v570_v8  ;;  %v98_v2 = vld [vmem:[%s2271_s7 + $0x20] sm:$0xff]  ;;  %v97_v3 = vld [vmem:[%s2271_s7 + $0x18] sm:$0xff]  ;;  %v96_v4 = vld [vmem:[%s2271_s7 + $0x10] sm:$0xff] }
 0x3f7   :  { %v95_v8 = vld [vmem:[%s2271_s7 + $0x8] sm:$0xff] }
 0x3f8   :  { %v1910_v19 = vadd.f32 %v579_v63, %v578_v12  ;;  %v1912_v20 = vadd.f32 %v579_v63, %v577_v15  ;;  %v1914_v21 = vadd.f32 %v579_v63, %v576_v16  ;;  %v1916_v14 = vadd.f32 %v579_v63, %v575_v18  ;;  %v94_v12 = vld [vmem:[%s2271_s7] sm:$0xff]  ;;  %v93_v15 = vld [vmem:[%s2270_s6 + $0x38] sm:$0xff]  ;;  %v92_v16 = vld [vmem:[%s2270_s6 + $0x30] sm:$0xff] }
 0x3f9   :  { %726 = vmatpush.msrb.mxu3 %v93_v15  ;;  %v91_v18 = vld [vmem:[%s2270_s6 + $0x28] sm:$0xff] }
 0x3fa   :  { %596 = vmatpush.msrb.mxu2 %v1910_v19  ;;  %625 = vrot.lane.b32.xlu1 %v1912_v20, %s1529_s16 }
 0x3fb   :  { %623 = vrot.lane.b32.xlu0 %v1914_v21, %s1529_s16  ;;  %621 = vrot.lane.b32.xlu2 %v1916_v14, %s1529_s16 }
 0x3fc   :  { %597 = vmatpush.msrb.mxu2 %v1912_v20  ;;  %727 = vmatpush.msrb.mxu3 %v92_v16 }
 0x3fe   :  { %598 = vmatpush.msrb.mxu2 %v1914_v21  ;;  %728 = vmatpush.msrb.mxu3 %v91_v18 }
 0x400   :  { %599 = vmatpush.msrb.mxu2 %v1916_v14  ;;  %729 = vmatpush.msrb.mxu3 %v90_v59 }
 0x401   :  { %1393 = vmatmul.msk.f32.vlgmr.msrb.gmra.mxu2 %vm137_vm1, %v1631_v6  ;;  %v84_v6 = vld [vmem:[%s2269_s5 + $0x30] sm:$0xff] }
 0x402   :  { %659 = vmatpush.msrb.mxu1 %v84_v6  ;;  %v89_v6 = vld [vmem:[%s2270_s6 + $0x18] sm:$0xff] }
 0x403   :  { %627 = vrot.lane.b32.xlu2 %v1910_v19, %s1529_s16  ;;  %730 = vmatpush.msrb.mxu3 %v89_v6 }
 0x404   :  { %660 = vmatpush.msrb.mxu1 %v83_v47  ;;  %v88_v47 = vld [vmem:[%s2270_s6 + $0x10] sm:$0xff] }
 0x405   :  { %731 = vmatpush.msrb.mxu3 %v88_v47 }
 0x409   :  { %1394 = vmatmul.msk.f32.gmra.mxu2 %vm137_vm1, %v1647_v9  ;;  %v82_v9 = vld [vmem:[%s2269_s5 + $0x20] sm:$0xff] }
 0x40a   :  { %661 = vmatpush.msrb.mxu1 %v82_v9  ;;  %v87_v9 = vld [vmem:[%s2270_s6 + $0x8] sm:$0xff] }
 0x40b   :  { %732 = vmatpush.msrb.mxu3 %v87_v9 }
 0x411   :  { %1395 = vmatmul.msk.f32.gmra.mxu2 %vm137_vm1, %v1687_v23  ;;  %v81_v23 = vld [vmem:[%s2269_s5 + $0x18] sm:$0xff] }
 0x412   :  { %662 = vmatpush.msrb.mxu1 %v81_v23  ;;  %v86_v23 = vld [vmem:[%s2270_s6] sm:$0xff] }
 0x413   :  { %733 = vmatpush.msrb.mxu3 %v86_v23 }
 0x415   :  { %1051 = vmatpush.msra.mxu3 %v1637_v7 }
 0x417   :  { %1052 = vmatpush.msra.mxu3 %v1610_v0 }
 0x419   :  { %1396 = vmatmul.msk.f32.gmra.mxu2 %vm137_vm1, %v1695_v28  ;;  %v80_v28 = vld [vmem:[%s2269_s5 + $0x10] sm:$0xff]  ;;  %s1536_s5 = smov 8  }
 0x41a   :  { %663 = vmatpush.msrb.mxu1 %v80_v28 }
 0x41c   :  { %664 = vmatpush.msrb.mxu1 %v79_v49 }
 0x41e   :  { %665 = vmatpush.msrb.mxu1 %v78_v50 }
 0x455   :  { %v1963_v27 = vpop.permute.xlu2 %621 }
 0x456   :  { %v767_v28 = vsel %vm137_vm1, %v1776_v11, %v1963_v27 }
 0x45d   :  { %v1986_v39 = vpop.permute.xlu2 %627 }
 0x46c   :  { %v1977_v35 = vpop.permute.xlu1 %625 }
 0x46d   :  { %v1969_v32 = vpop.permute.xlu0 %623  ;;  %v769_v7 = vsel %vm137_vm1, %v1766_v26, %v1977_v35 }
 0x484   :  { %v601_v22 = vpop.f32.mrf.mxu2 }
 0x485   :  { %v613_v24 = vmul.f32 %v1699_v31, %v601_v22  ;;  %v768_v22 = vsel %vm137_vm1, %v1773_v13, %v1969_v32 }
 0x487   :  { %v633_v29 = vsel %vm137_vm1, %v613_v24, %v1963_v27 }
 0x488   :  { %1397 = vmatmul.msk.f32.vlgmr.msrb.gmra.mxu1 %vm204_vm2, %v633_v29 }
 0x48c   :  { %v604_v30 = vpop.f32.mrf.mxu2 }
 0x48d   :  { %v614_v10 = vmul.f32 %v1704_v36, %v604_v30 }
 0x48f   :  { %v634_v33 = vsel %vm137_vm1, %v614_v10, %v1969_v32 }
 0x490   :  { %1398 = vmatmul.msk.f32.gmra.mxu1 %vm204_vm2, %v634_v33  ;;  %v770_v33 = vsel %vm137_vm1, %v1764_v25, %v1986_v39 }
 0x494   :  { %v607_v34 = vpop.f32.mrf.mxu2 }
 0x495   :  { %v1975_v31 = vmul.f32 %v1715_v46, %v607_v34  ;;  %v1995_v46 = vld [vmem:[%s2273_s9] sm:$0x3] }
 0x496   :  { %v637_v41 = vperm.slane %v1995_v46, 0 }
 0x497   :  { %v635_v37 = vsel %vm137_vm1, %v1975_v31, %v1977_v35 }
 0x498   :  { %1399 = vmatmul.msk.f32.gmra.mxu1 %vm204_vm2, %v635_v37 }
 0x49c   :  { %v610_v36 = vpop.f32.mrf.mxu2 }
 0x49d   :  { %v1984_v38 = vmul.f32 %v1720_v52, %v610_v36  ;;  %v102_v52 = vld [vmem:[%s2271_s7 + $0x40] sm:$0xff]  ;;  %v775_v36 = vperm.slane %v1995_v46, 1  ;;  %s1357_s7 = sshll.u32 %s1541_s11, 4  ;;  %s1358_s7 = int_to_ptr.vmem [resolvable:$true] %s1357_s7 }
 0x49e   :  { %796 = vmatpush.msra.mxu0 %v102_v52 }
 0x49f   :  { %v636_v40 = vsel %vm137_vm1, %v1984_v38, %v1986_v39 }
 0x4a0   :  { %1400 = vmatmul.msk.f32.gmra.mxu1 %vm204_vm2, %v636_v40  ;;  %797 = vmatpush.msra.mxu0 %v101_v42 }
 0x4a2   :  { %798 = vmatpush.msra.mxu0 %v100_v43 }
 0x4a4   :  { %799 = vmatpush.msra.mxu0 %v99_v48 }
 0x4a6   :  { %800 = vmatpush.msra.mxu0 %v98_v2 }
 0x4a8   :  { %801 = vmatpush.msra.mxu0 %v97_v3 }
 0x4aa   :  { %802 = vmatpush.msra.mxu0 %v96_v4 }
 0x4ac   :  { %803 = vmatpush.msra.mxu0 %v95_v8 }
 0x4ae   :  { %804 = vmatpush.msra.mxu0 %v94_v12 }
 0x505   :  { %v667_v44 = vpop.f32.mrf.mxu1 }
 0x506   :  { %v668_v45 = vadd.f32 %v667_v44, %v637_v41 }
 0x508   :  { %v679_v51 = vmul.f32 %v668_v45, %v1725_v58 }
 0x50a   :  { %755 = vrot.lane.b32.xlu0 %v679_v51, %s1532_s26 }
 0x50d   :  { %v670_v53 = vpop.f32.mrf.mxu1 }
 0x50e   :  { %v671_v54 = vadd.f32 %v670_v53, %v637_v41 }
 0x510   :  { %v680_v55 = vmul.f32 %v671_v54, %v1733_v1  ;;  %v2101_v54 = vld [vmem:[%s2274_s10] ss:$0 sm:$0xff] }
 0x512   :  { %757 = vrot.lane.b32.xlu1 %v680_v55, %s1532_s26 }
 0x515   :  { %v673_v56 = vpop.f32.mrf.mxu1 }
 0x516   :  { %v674_v57 = vadd.f32 %v673_v56, %v637_v41 }
 0x518   :  { %v681_v60 = vmul.f32 %v674_v57, %v1737_v5 }
 0x51a   :  { %687 = vrot.lane.b32.xlu1 %v613_v24, %s1531_s8  ;;  %759 = vrot.lane.b32.xlu2 %v681_v60, %s1532_s26 }
 0x51d   :  { %v676_v61 = vpop.f32.mrf.mxu1 }
 0x51e   :  { %v677_v62 = vadd.f32 %v676_v61, %v637_v41 }
 0x520   :  { %v682_v63 = vmul.f32 %v677_v62, %v1748_v17 }
 0x522   :  { %689 = vrot.lane.b32.xlu2 %v614_v10, %s1531_s8  ;;  %761 = vrot.lane.b32.xlu0 %v682_v63, %s1532_s26 }
 0x574   :  { %v760_v0 = vpop.permute.xlu2 %759 }
 0x575   :  { %v773_v10 = vsel %vm204_vm2, %v769_v7, %v760_v0 }
 0x57c   :  { %v756_v49 = vpop.permute.xlu0 %755  ;;  %v690_v32 = vpop.permute.xlu2 %689 }
 0x57d   :  { %v771_v50 = vsel %vm204_vm2, %v767_v28, %v756_v49  ;;  %v700_v37 = vsel %vm137_vm1, %v690_v32, %v1914_v21 }
 0x57e   :  { %1405 = vmatmul.msk.f32.vlgmr.msra.gmra.mxu0 %vm776_vm9, %v771_v50 }
 0x584   :  { %v758_v24 = vpop.permute.xlu1 %757 }
 0x585   :  { %v772_v29 = vsel %vm204_vm2, %v768_v22, %v758_v24 }
 0x586   :  { %1406 = vmatmul.msk.f32.gmra.mxu0 %vm776_vm9, %v772_v29 }
 0x58c   :  { %v688_v27 = vpop.permute.xlu1 %687 }
 0x58d   :  { %v699_v30 = vsel %vm137_vm1, %v688_v27, %v1916_v14 }
 0x58e   :  { %1401 = vmatmul.msk.f32.vlgmr.msrb.gmra.mxu3 %vm204_vm2, %v699_v30  ;;  %1407 = vmatmul.msk.f32.gmra.mxu0 %vm776_vm9, %v773_v10 }
 0x594   :  { %v762_v34 = vpop.permute.xlu0 %761 }
 0x595   :  { %v774_v35 = vsel %vm204_vm2, %v770_v33, %v762_v34 }
 0x596   :  { %1402 = vmatmul.msk.f32.gmra.mxu3 %vm204_vm2, %v700_v37  ;;  %1408 = vmatmul.msk.f32.gmra.mxu0 %vm776_vm9, %v774_v35 }
 0x5fb   :  { %v806_v40 = vpop.f32.mrf.mxu0 }
 0x5fc   :  { %v807_v41 = vadd.f32 %v806_v40, %v775_v36 }
 0x5fe   :  { %v819_v52 = vsel %vm818_vm10, %v807_v41, -inf }
 0x5ff   :  { %820 = vmax.xlane.f32.xlu0 %v819_v52 }
 0x603   :  { %v809_v42 = vpop.f32.mrf.mxu0 }
 0x604   :  { %v810_v39 = vadd.f32 %v809_v42, %v775_v36 }
 0x606   :  { %v822_v43 = vsel %vm818_vm10, %v810_v39, -inf }
 0x607   :  { %823 = vmax.xlane.f32.xlu1 %v822_v43 }
 0x60b   :  { %v812_v44 = vpop.f32.mrf.mxu0 }
 0x60c   :  { %v813_v45 = vadd.f32 %v812_v44, %v775_v36 }
 0x60e   :  { %v825_v48 = vsel %vm818_vm10, %v813_v45, -inf }
 0x60f   :  { %826 = vmax.xlane.f32.xlu2 %v825_v48 }
 0x611   :  { %v735_v55 = vpop.f32.mrf.mxu3 }
 0x612   :  { %v736_v56 = vadd.f32 %v2101_v54, %v735_v55 }
 0x613   :  { %v815_v51 = vpop.f32.mrf.mxu0 }
 0x614   :  { %v816_v53 = vadd.f32 %v815_v51, %v775_v36  ;;  %v747_v57 = vmul.f32 %v736_v56, %v1725_v58 }
 0x616   :  { %v828_v46 = vsel %vm818_vm10, %v816_v53, -inf }
 0x617   :  { %829 = vmax.xlane.f32.xlu0 %v828_v46 }
 0x619   :  { %v738_v22 = vpop.f32.mrf.mxu3 }
 0x61a   :  { %v739_v24 = vadd.f32 %v2101_v54, %v738_v22 }
 0x61c   :  { %v748_v29 = vmul.f32 %v739_v24, %v1733_v1 }
 0x620   :  { %693 = vrot.lane.b32.xlu1 %v1984_v38, %s1531_s8 }
 0x627   :  { %691 = vrot.lane.b32.xlu2 %v1975_v31, %s1531_s8 }
 0x628   :  { %869 = vrot.lane.b32.xlu1 %v1773_v13, %s1531_s8 }
 0x630   :  { %867 = vrot.lane.b32.xlu1 %v1776_v11, %s1531_s8 }
 0x638   :  { %883 = vrot.lane.b32.xlu1 %v747_v57, %s1532_s26 }
 0x672   :  { %v821_v38 = vpop.xlane.xlu0 %820 }
 0x673   :  { %v831_v31 = vsub.f32 %v807_v41, %v821_v38 }
 0x675   :  { %v835_v60 = vmul.f32 1.442695, %v831_v31 }
 0x677   :  { %1448 = vpow2.f32 %v835_v60 }
 0x67a   :  { %v824_v13 = vpop.xlane.xlu1 %823 }
 0x67b   :  { %v832_v61 = vsub.f32 %v810_v39, %v824_v13 }
 0x67d   :  { %v1449_v62 = vpop.eup %1448  ;;  %v837_v63 = vmul.f32 1.442695, %v832_v61 }
 0x67e   :  { %v843_v2 = vsel %vm818_vm10, %v1449_v62, 0.0 }
 0x67f   :  { %1450 = vpow2.f32 %v837_v63  ;;  %844 = vadd.xlane.f32.xlu0 %v843_v2 }
 0x682   :  { %v827_v3 = vpop.xlane.xlu2 %826 }
 0x683   :  { %v833_v11 = vsub.f32 %v813_v45, %v827_v3 }
 0x685   :  { %v1451_v4 = vpop.eup %1450  ;;  %v839_v8 = vmul.f32 1.442695, %v833_v11 }
 0x686   :  { %v846_v12 = vsel %vm818_vm10, %v1451_v4, 0.0 }
 0x687   :  { %1452 = vpow2.f32 %v839_v8  ;;  %847 = vadd.xlane.f32.xlu0 %v846_v12 }
 0x68a   :  { %v692_v15 = vpop.permute.xlu2 %691  ;;  %v830_v16 = vpop.xlane.xlu0 %829 }
 0x68b   :  { %v834_v18 = vsub.f32 %v816_v53, %v830_v16  ;;  %v701_v59 = vsel %vm137_vm1, %v692_v15, %v1912_v20 }
 0x68c   :  { %1403 = vmatmul.msk.f32.gmra.mxu3 %vm204_vm2, %v701_v59 }
 0x68d   :  { %v1453_v6 = vpop.eup %1452  ;;  %v841_v47 = vmul.f32 1.442695, %v834_v18 }
 0x68e   :  { %v849_v9 = vsel %vm818_vm10, %v1453_v6, 0.0 }
 0x68f   :  { %1454 = vpow2.f32 %v841_v47  ;;  %850 = vadd.xlane.f32.xlu0 %v849_v9 }
 0x692   :  { %v694_v23 = vpop.permute.xlu1 %693 }
 0x693   :  { %v702_v28 = vsel %vm137_vm1, %v694_v23, %v1910_v19 }
 0x694   :  { %1404 = vmatmul.msk.f32.gmra.mxu3 %vm204_vm2, %v702_v28 }
 0x695   :  { %v1455_v49 = vpop.eup %1454 }
 0x696   :  { %v852_v50 = vsel %vm818_vm10, %v1455_v49, 0.0 }
 0x697   :  { %853 = vadd.xlane.f32.xlu2 %v852_v50 }
 0x69a   :  { %v870_v32 = vpop.permute.xlu1 %869 }
 0x69b   :  { %v896_v48 = vsel %vm137_vm1, %v870_v32, %v1914_v21 }
 0x6a2   :  { %v868_v36 = vpop.permute.xlu1 %867 }
 0x6a3   :  { %885 = vrot.lane.b32.xlu0 %v748_v29, %s1532_s26  ;;  %v895_v51 = vsel %vm137_vm1, %v868_v36, %v1916_v14  ;;  %v1472_v14 = vld [vmem:[%s2265_s1 + $0x8] sm:$0xff] }
 0x6aa   :  { %v884_v44 = vpop.permute.xlu1 %883 }
 0x6ab   :  { %v899_v46 = vsel %vm204_vm2, %v895_v51, %v884_v44 }
 0x6ac   :  { %v903_v31 = vmul.f32 %v899_v46, %v1725_v58 }
 0x6af   :  { %873 = vrot.lane.b32.xlu2 %v1764_v25, %s1531_s8 }
 0x6f2   :  { %v845_v0 = vpop.xlane.xlu0 %844 }
 0x6f3   :  { %1456 = vrcp.f32 %v845_v0 }
 0x6f9   :  { %v1457_v7 = vpop.eup %1456 }
 0x6fa   :  { %v859_v27 = vmul.f32 %v1457_v7, %v1449_v62  ;;  %v848_v30 = vpop.xlane.xlu0 %847  ;;  %v1104_v62 = vmul.f32 %v1472_v14, %v1472_v14 }
 0x6fb   :  { %1458 = vrcp.f32 %v848_v30 }
 0x6fc   :  { %v2124_v10 = vmul.f32 %v859_v27, %v1725_v58  ;;  %v1110_v63 = vsel %vm106_vm0, %v1104_v62, 0.0 }
 0x6fe   :  { %907 = vxpose.xlu1.b32.start [1/2] (short) (narrow) %v2124_v10, 8  ;;  %v1228_v3 = vadd.f32 1e-15, %v2124_v10  ;;  %v1224_v59 = vsub.f32 0.0, %v2124_v10 }
 0x701   :  { %v1459_v33 = vpop.eup %1458 }
 0x702   :  { %v860_v34 = vmul.f32 %v1459_v33, %v1451_v4  ;;  %v851_v37 = vpop.xlane.xlu0 %850  ;;  %v1475_v4 = vld [vmem:[%s2265_s1 + $0x18] sm:$0xff] }
 0x703   :  { %1460 = vrcp.f32 %v851_v37  ;;  %v1106_v8 = vmul.f32 %v1475_v4, %v1475_v4 }
 0x704   :  { %v2128_v35 = vmul.f32 %v860_v34, %v1733_v1 }
 0x705   :  { %v1116_v16 = vsel %vm106_vm0, %v1106_v8, 0.0 }
 0x706   :  { %908 = vxpose.xlu1.b32.end [2/2] (short) (narrow) %v2128_v35, 8  ;;  %1177 = vmatpush.msrb.mxu3 %v2128_v35  ;;  %v1229_v12 = vadd.f32 1e-15, %v2128_v35 }
 0x708   :  { %1178 = vmatpush.msrb.mxu3 %v2124_v10 }
 0x709   :  { %v1461_v25 = vpop.eup %1460 }
 0x70a   :  { %v861_v40 = vmul.f32 %v1461_v25, %v1453_v6  ;;  %v854_v41 = vpop.xlane.xlu2 %853 }
 0x70b   :  { %1462 = vrcp.f32 %v854_v41 }
 0x70c   :  { %v2134_v52 = vmul.f32 %v861_v40, %v1737_v5  ;;  %1464 = vlog2.f32 %v1228_v3  ;;  %v1123_v40 = vlaneseq }
 0x70d   :  { %1466 = vlog2.f32 %v1229_v12 }
 0x70e   :  { %962 = vxpose.xlu0.b32.start [1/2] (short) (narrow) %v2134_v52, 8  ;;  %v1230_v27 = vadd.f32 1e-15, %v2134_v52  ;;  %v2192_v41 = vand.u32 127, %v1123_v40 }
 0x70f   :  { %v741_v42 = vpop.f32.mrf.mxu3 }
 0x710   :  { %v742_v60 = vadd.f32 %v2101_v54, %v741_v42  ;;  %1468 = vlog2.f32 %v1230_v27 }
 0x711   :  { %v1463_v39 = vpop.eup %1462 }
 0x712   :  { %v862_v43 = vmul.f32 %v1463_v39, %v1455_v49  ;;  %v749_v58 = vmul.f32 %v742_v60, %v1737_v5  ;;  %v1465_v15 = vpop.eup %1464  ;;  %v874_v28 = vpop.permute.xlu2 %873  ;;  %v1225_v49 = vsub.f32 0.0, %v2128_v35 }
 0x713   :  { %v1233_v18 = vmul.f32 0.6931472, %v1465_v15  ;;  %v1467_v47 = vpop.eup %1466  ;;  %v898_v24 = vsel %vm137_vm1, %v874_v28, %v1910_v19  ;;  %v1226_v19 = vsub.f32 0.0, %v2134_v52 }
 0x714   :  { %v2138_v45 = vmul.f32 %v862_v43, %v1748_v17  ;;  %v1235_v23 = vmul.f32 0.6931472, %v1467_v47  ;;  %v2196_v43 = vadd.s32 4294967288, %v2192_v41 }
 0x715   :  { %v886_v53 = vpop.permute.xlu0 %885  ;;  %v1240_v6 = vmul.f32 %v1233_v18, %v1224_v59 }
 0x716   :  { %v900_v55 = vsel %vm204_vm2, %v896_v48, %v886_v53  ;;  %963 = vxpose.xlu0.b32.end [2/2] (short) (narrow) %v2138_v45, 8  ;;  %v1241_v50 = vmul.f32 %v1235_v23, %v1225_v49  ;;  %v1469_v30 = vpop.eup %1468  ;;  %v1231_v39 = vadd.f32 1e-15, %v2138_v45 }
 0x717   :  { %v904_v56 = vmul.f32 %v900_v55, %v1733_v1  ;;  %v744_v57 = vpop.f32.mrf.mxu3  ;;  %v1473_v1 = vld [vmem:[%s2265_s1] sm:$0xff]  ;;  %v1244_v9 = vsel %vm818_vm10, %v1240_v6, 0.0  ;;  %v1237_v33 = vmul.f32 0.6931472, %v1469_v30 }
 0x718   :  { %v745_v38 = vadd.f32 %v2101_v54, %v744_v57  ;;  %v1103_v13 = vmul.f32 %v1473_v1, %v1473_v1  ;;  %v1474_v54 = vld [vmem:[%s2265_s1 + $0x10] sm:$0xff]  ;;  %v1247_v22 = vsel %vm818_vm10, %v1241_v50, 0.0  ;;  %1470 = vlog2.f32 %v1231_v39  ;;  %s1534_s1 = smov 24  }
 0x719   :  { %956 = vmatpush.msra.mxu2 %v904_v56  ;;  %v1105_v2 = vmul.f32 %v1474_v54, %v1474_v54  ;;  %v1242_v34 = vmul.f32 %v1237_v33, %v1226_v19 }
 0x71a   :  { %v750_v21 = vmul.f32 %v745_v38, %v1748_v17  ;;  %v1107_v61 = vsel %vm106_vm0, %v1103_v13, 0.0 }
 0x71b   :  { %957 = vmatpush.msra.mxu2 %v903_v31  ;;  %v1113_v11 = vsel %vm106_vm0, %v1105_v2, 0.0 }
 0x71c   :  { %889 = vrot.lane.b32.xlu2 %v750_v21, %s1532_s26 }
 0x71d   :  { %1031 = vmatpush.msrb.mxu2 %v1472_v14  ;;  %v1227_v14 = vsub.f32 0.0, %v2138_v45 }
 0x71e   :  { %v1471_v56 = vpop.eup %1470 }
 0x71f   :  { %1032 = vmatpush.msrb.mxu2 %v1473_v1  ;;  %v1239_v21 = vmul.f32 0.6931472, %v1471_v56 }
 0x721   :  { %v1243_v60 = vmul.f32 %v1239_v21, %v1227_v14 }
 0x723   :  { %v1253_v1 = vsel %vm818_vm10, %v1243_v60, 0.0 }
 0x724   :  { %887 = vrot.lane.b32.xlu2 %v749_v58, %s1532_s26 }
 0x74d   :  { %1108 = vadd.xlane.f32.xlu2 %v1107_v61 }
 0x755   :  { %1111 = vadd.xlane.f32.xlu2 %v1110_v63 }
 0x75d   :  { %1114 = vadd.xlane.f32.xlu2 %v1113_v11  ;;  %v1533_v11 = vmov 0.0  }
 0x765   :  { %1117 = vadd.xlane.f32.xlu2 %v1116_v16 }
 0x76d   :  { %1245 = vadd.xlane.f32.xlu2 %v1244_v9 }
 0x775   :  { %1248 = vadd.xlane.f32.xlu2 %v1247_v22 }
 0x776   :  { %v890_v29 = vpop.permute.xlu2 %889 }
 0x777   :  { %v902_v0 = vsel %vm204_vm2, %v898_v24, %v890_v29 }
 0x778   :  { %v906_v7 = vmul.f32 %v902_v0, %v1748_v17  ;;  %v1250_v17 = vsel %vm818_vm10, %v1242_v34, 0.0 }
 0x77a   :  { %1011 = vmatpush.msra.mxu1 %v906_v7 }
 0x77e   :  { %v888_v37 = vpop.permute.xlu2 %887 }
 0x784   :  { %871 = vrot.lane.b32.xlu0 %v1766_v26, %s1531_s8  ;;  %s1535_s8 = smov 56  }
 0x7a2   :  { %v923_v32 = vpop.trf.xlu1 }
 0x7a3   :  { %1409 = vmatmul.msk.f32.vlgmr.msra.gmra.mxu2 %vm106_vm0, %v923_v32 }
 0x7a4   :  { %1097 = vmatpush.msra.mxu2 %v2138_v45 }
 0x7a6   :  { %1098 = vmatpush.msra.mxu2 %v2134_v52 }
 0x7ab   :  { %1411 = vmatmul.msk.f32.vlgmr.msrb.gmra.mxu2 %vm106_vm0, %v923_v32 }
 0x7ae   :  { %1251 = vadd.xlane.f32.xlu0 %v1250_v17 }
 0x7b2   :  { %v978_v26 = vpop.trf.xlu0 }
 0x7b3   :  { %1412 = vmatmul.msk.f32.vlgmr.msra.gmra.mxu3 %vm106_vm0, %v978_v26 }
 0x7bb   :  { %1416 = vmatmul.msk.f32.vlgmr.msrb.gmra.mxu3 %vm106_vm0, %v923_v32 }
 0x7c0   :  { %v1109_v25 = vpop.xlane.xlu2 %1108 }
 0x7c1   :  { %v1125_v44 = vperm.slane %v1109_v25, %v2192_v41 }
 0x7c8   :  { %v1112_v36 = vpop.xlane.xlu2 %1111 }
 0x7c9   :  { %v1127_v48 = vperm.slane %v1112_v36, %v2196_v43 }
 0x7cb   :  { %v1129_v55 = vsel %vm1128_vm11, %v1127_v48, %v1125_v44 }
 0x7d0   :  { %v1115_v42 = vpop.xlane.xlu2 %1114 }
 0x7d1   :  { %v1130_v51 = vperm.slane %v1115_v42, %v2192_v41 }
 0x7d8   :  { %v1118_v53 = vpop.xlane.xlu2 %1117 }
 0x7d9   :  { %v1131_v46 = vperm.slane %v1118_v53, %v2196_v43 }
 0x7db   :  { %v1132_v57 = vsel %vm1128_vm11, %v1131_v46, %v1130_v51 }
 0x7dc   :  { %v1134_v38 = vsel %vm1133_vm12, %v1132_v57, %v1129_v55 }
 0x7dd   :  { %v1137_v31 = vsel %vm1136_vm13, %v1134_v38, 0.0 }
 0x7de   :  { %1138 = vadd.xlane.f32.xlu1 %v1137_v31 }
 0x7e0   :  { %v1246_v44 = vpop.xlane.xlu2 %1245 }
 0x7e1   :  { %v1260_v57 = vperm.slane %v1246_v44, %v2192_v41 }
 0x7e6   :  { %1254 = vadd.xlane.f32.xlu1 %v1253_v1 }
 0x7e8   :  { %v1249_v51 = vpop.xlane.xlu2 %1248 }
 0x7e9   :  { %v1261_v55 = vperm.slane %v1249_v51, %v2196_v43 }
 0x7eb   :  { %v1262_v31 = vsel %vm1128_vm11, %v1261_v55, %v1260_v57 }
 0x7f6   :  { %v872_v58 = vpop.permute.xlu0 %871 }
 0x7f7   :  { %v897_v13 = vsel %vm137_vm1, %v872_v58, %v1912_v20 }
 0x7f8   :  { %v901_v61 = vsel %vm204_vm2, %v897_v13, %v888_v37 }
 0x7f9   :  { %v905_v62 = vmul.f32 %v901_v61, %v1737_v5 }
 0x7fb   :  { %1012 = vmatpush.msra.mxu1 %v905_v62 }
 0x7fc   :  { %1410 = vmatmul.msk.f32.vlgmr.msra.gmra.mxu1 %vm106_vm0, %v978_v26 }
 0x7fd   :  { %1074 = vmatpush.msrb.mxu1 %v2128_v35 }
 0x7ff   :  { %1075 = vmatpush.msrb.mxu1 %v2124_v10 }
 0x801   :  { %1197 = vmatpush.msra.mxu1 %v2138_v45 }
 0x803   :  { %1198 = vmatpush.msra.mxu1 %v2134_v52  ;;  %v1141_v52 = vshrl.u32 %v1123_v40, 7 }
 0x805   :  { %vm1142_vm15 = vcmp.eq.s32.totalorder %v1141_v52, %v2192_v41 }
 0x806   :  { %v1415_v4 = vsel %vm1142_vm15, 1.0, %v1533_v11 }
 0x821   :  { %v1252_v53 = vpop.xlane.xlu0 %1251 }
 0x822   :  { %v1263_v56 = vperm.slane %v1252_v53, %v2192_v41 }
 0x826   :  { %v959_v63 = vpop.f32.mrf.mxu2 }
 0x827   :  { %v1272_v54 = vsel %vm1271_vm14, %v959_v63, 0.0 }
 0x828   :  { %1274 = vst [vmem:[#allocation2] sm:$0xff] %v1272_v54 }
 0x82e   :  { %v1034_v20 = vpop.f32.mrf.mxu2 }
 0x82f   :  { %1413 = vmatmul.msk.f32.vlgmr.msrb.gmra.mxu1 %vm106_vm0, %v1034_v20 }
 0x836   :  { %v1054_v2 = vpop.f32.mrf.mxu3 }
 0x837   :  { %1414 = vmatmul.msk.f32.vlgmr.msra.gmra.mxu2 %vm106_vm0, %v1054_v2  ;;  %1417 = vmatmul.msk.f32.vlgmr.msra.gmra.mxu1 %vm106_vm0, %v978_v26 }
 0x83e   :  { %v1180_v5 = vpop.f32.mrf.mxu3 }
 0x83f   :  { %v1203_v35 = vmul.f32 %v1180_v5, %v1180_v5 }
 0x841   :  { %v1205_v10 = vsel %vm818_vm10, %v1203_v35, 0.0 }
 0x842   :  { %1206 = vadd.xlane.f32.xlu2 %v1205_v10 }
 0x851   :  { %v1139_v39 = vpop.xlane.xlu1 %1138 }
 0x859   :  { %v1255_v48 = vpop.xlane.xlu1 %1254 }
 0x85a   :  { %v1264_v46 = vperm.slane %v1255_v48, %v2196_v43 }
 0x85c   :  { %v1265_v38 = vsel %vm1128_vm11, %v1264_v46, %v1263_v56 }
 0x85d   :  { %v1266_v21 = vsel %vm1133_vm12, %v1265_v38, %v1262_v31 }
 0x85e   :  { %v1268_v14 = vsel %vm1136_vm13, %v1266_v21, 0.0 }
 0x879   :  { %v1014_v45 = vpop.f32.mrf.mxu1 }
 0x87a   :  { %v1273_v3 = vsel %vm1271_vm14, %v1014_v45, 0.0 }
 0x87b   :  { %1275 = vst [vmem:[#allocation2 + $0x8] sm:$0xff] %v1273_v3 }
 0x87c   :  { %1351 = dma.vmem_to_hbm [thread:$0]  %s1344_s4, 256, %s1346_s3, [#allocation3], %s1540_s22, %s1540_s22, %s1536_s5  }
 0x8ac   :  { %v1077_v8 = vpop.f32.mrf.mxu1 }
 0x8ad   :  { %v1145_v12 = vmul.f32 %v1415_v4, %v1077_v8  ;;  %v1292_v9 = vrot.slane %v1077_v8, 3  ;;  %v1316_v29 = vrot.slane %v1077_v8, 7  ;;  %v1281_v7 = vrot.slane %v1077_v8, 1 }
 0x8ae   :  { %v1286_v32 = vrot.slane %v1077_v8, 2  ;;  %v1298_v34 = vrot.slane %v1077_v8, 4  ;;  %v1304_v37 = vrot.slane %v1077_v8, 5  ;;  %v1310_v40 = vrot.slane %v1077_v8, 6 }
 0x8af   :  { %v1147_v15 = vsel %vm818_vm10, %v1145_v12, 0.0 }
 0x8b0   :  { %1148 = vadd.xlane.f32.xlu2 %v1147_v15 }
 0x8b4   :  { %v1200_v16 = vpop.f32.mrf.mxu1 }
 0x8b5   :  { %v1204_v18 = vmul.f32 %v1200_v16, %v1200_v16  ;;  %v1207_v60 = vpop.xlane.xlu2 %1206 }
 0x8b6   :  { %v1213_v20 = vperm.slane %v1207_v60, %v2192_v41 }
 0x8b7   :  { %v1208_v59 = vsel %vm818_vm10, %v1204_v18, 0.0 }
 0x8b8   :  { %1209 = vadd.xlane.f32.xlu2 %v1208_v59 }
 0x8ba   :  { %v1100_v6 = vpop.f32.mrf.mxu2 }
 0x8bb   :  { %v1146_v47 = vmul.f32 %v1415_v4, %v1100_v6  ;;  %v1293_v23 = vrot.slane %v1100_v6, 2  ;;  %v1278_v50 = vrot.slane %v1100_v6, 7  ;;  %v1317_v24 = vrot.slane %v1100_v6, 6 }
 0x8bc   :  { %v1282_v27 = vsel %vm1133_vm12, %v1100_v6, %v1281_v7  ;;  %v1287_v30 = vrot.slane %v1100_v6, 1  ;;  %v1299_v19 = vrot.slane %v1100_v6, 3  ;;  %v1305_v26 = vrot.slane %v1100_v6, 4 }
 0x8bd   :  { %v1150_v28 = vsel %vm818_vm10, %v1146_v47, 0.0  ;;  %v1294_v49 = vsel %vm1133_vm12, %v1293_v23, %v1292_v9  ;;  %v2227_v22 = vsel %vm1133_vm12, %v1278_v50, %v1077_v8  ;;  %v1318_v0 = vsel %vm1133_vm12, %v1317_v24, %v1316_v29 }
 0x8be   :  { %1151 = vadd.xlane.f32.xlu1 %v1150_v28  ;;  %1295 = vrot.lane.b32.xlu0 %v1294_v49, %s1534_s1  ;;  %v1288_v33 = vsel %vm1133_vm12, %v1287_v30, %v1286_v32  ;;  %v1300_v17 = vsel %vm1133_vm12, %v1299_v19, %v1298_v34  ;;  %v1306_v25 = vsel %vm1133_vm12, %v1305_v26, %v1304_v37  ;;  %v1311_v36 = vrot.slane %v1100_v6, 5 }
 0x8c0   :  { %v1312_v42 = vsel %vm1133_vm12, %v1311_v36, %v1310_v40 }
 0x8c6   :  { %1319 = vrot.lane.b32.xlu0 %v1318_v0, %s1535_s8 }
 0x8d0   :  { %1283 = vrot.lane.b32.xlu2 %v1282_v27, %s1536_s5 }
 0x8d7   :  { %1289 = vrot.lane.b32.xlu1 %v1288_v33, %s1528_s25 }
 0x8df   :  { %1301 = vrot.lane.b32.xlu1 %v1300_v17, %s1529_s16 }
 0x8e7   :  { %1307 = vrot.lane.b32.xlu1 %v1306_v25, %s1537_s19 }
 0x8ef   :  { %1313 = vrot.lane.b32.xlu1 %v1312_v42, %s1538_s20 }
 0x919   :  { %1269 = vadd.xlane.f32.xlu1 %v1268_v14 }
 0x923   :  { %v1149_v1 = vpop.xlane.xlu2 %1148 }
 0x924   :  { %v1155_v13 = vperm.slane %v1149_v1, %v2192_v41 }
 0x92b   :  { %v1210_v61 = vpop.xlane.xlu2 %1209 }
 0x92c   :  { %v1214_v54 = vperm.slane %v1210_v61, %v2192_v41 }
 0x92e   :  { %v1215_v2 = vsel %vm1133_vm12, %v1214_v54, %v1213_v20 }
 0x92f   :  { %v1217_v5 = vsel %vm1159_vm3, %v1215_v2, 0.0 }
 0x930   :  { %v1296_v11 = vpop.permute.xlu0 %1295 }
 0x931   :  { %v1152_v58 = vpop.xlane.xlu1 %1151 }
 0x932   :  { %v1156_v43 = vperm.slane %v1152_v58, %v2192_v41 }
 0x933   :  { %v1284_v45 = vpop.permute.xlu2 %1283 }
 0x934   :  { %v1157_v62 = vsel %vm1133_vm12, %v1156_v43, %v1155_v13  ;;  %v1322_v4 = vsel %vm818_vm10, %v2227_v22, %v1284_v45 }
 0x935   :  { %v1160_v63 = vsel %vm1159_vm3, %v1157_v62, 0.0 }
 0x936   :  { %1161 = vadd.xlane.f32.xlu2 %v1160_v63 }
 0x938   :  { %v1320_v23 = vpop.permute.xlu0 %1319 }
 0x93e   :  { %1218 = vadd.xlane.f32.xlu2 %v1217_v5 }
 0x949   :  { %v1290_v35 = vpop.permute.xlu1 %1289 }
 0x94a   :  { %v1323_v8 = vsel %vm106_vm0, %v1322_v4, %v1290_v35  ;;  %vm1336_vm0 = vcmask 539648  }
 0x94b   :  { %v1325_v15 = vsel %vm1324_vm4, %v1323_v8, %v1296_v11 }
 0x951   :  { %v1302_v10 = vpop.permute.xlu1 %1301 }
 0x952   :  { %v1326_v16 = vsel %vm137_vm1, %v1325_v15, %v1302_v10 }
 0x959   :  { %v1308_v3 = vpop.permute.xlu1 %1307 }
 0x95a   :  { %v1328_v59 = vsel %vm1327_vm5, %v1326_v16, %v1308_v3 }
 0x961   :  { %v1314_v12 = vpop.permute.xlu1 %1313 }
 0x962   :  { %v1330_v47 = vsel %vm1329_vm6, %v1328_v59, %v1314_v12 }
 0x963   :  { %v1332_v49 = vsel %vm1331_vm7, %v1330_v47, %v1320_v23 }
 0x98c   :  { %v1270_v50 = vpop.xlane.xlu1 %1269 }
 0x9a9   :  { %v1162_v52 = vpop.xlane.xlu2 %1161 }
 0x9aa   :  { %v1220_v41 = vmul.f32 2.0, %v1162_v52 }
 0x9ac   :  { %v1221_v18 = vsub.f32 %v1139_v39, %v1220_v41 }
 0x9b1   :  { %v1219_v6 = vpop.xlane.xlu2 %1218 }
 0x9b2   :  { %v1222_v9 = vadd.f32 %v1221_v18, %v1219_v6 }
 0x9b4   :  { %v1223_v28 = vmax.f32 %v1222_v9, 0.0 }
 0x9b6   :  { %v1333_v22 = vsel %vm204_vm2, %v1332_v49, %v1223_v28 }
 0x9b7   :  { %v1335_v24 = vsel %vm1334_vm8, %v1333_v22, %v1270_v50 }
 0x9b8   :  { %v1337_v29 = vsel %vm1336_vm0, %v1335_v24, 0.0 }
 0x9b9   :  { %1338 = vst [vmem:[#allocation4] sm:$0x3] %v1337_v29 }
 0x9ba   :  { %1362 = dma.vmem_to_hbm [thread:$0]  %s1358_s7, 32, %s1360_s24, [#allocation5]  }
 0x9bb   :  { %1524 = dma.done.wait [#allocation3], 256  }
 0x9bc   :  { %1525 = vsyncadd [#allocation3], 4294967040 }
 0x9bd   :  { %1526 = dma.done.wait [#allocation5], 32  }
 0x9be   :  { %1527 = vsyncadd [#allocation5], 4294967264 }
 0x9bf   :  { %1371 = vsyncpa [#allocation3], 1 }
 0x9c0   :  { %1372 = vsyncpa [#allocation5], 1 }

</bundles_post_ra>
